<compile_context>
chip_gen: v7x
topology: tpu7x:2x2x1
jax: 0.10.0
libtpu: 0.0.40
codegen_flags: <defaults>
</compile_context>

<pallas_src>
import jax
import jax.numpy as jnp
from jax.experimental import pallas as pl
from jax.experimental.pallas import tpu as pltpu

# ---- small, self-consistent hyperparameters (module globals scaled down) ----
EMBED = 128          # embed
HEAD = 4             # head
HEAD_SIZE = EMBED // HEAD
SEQ = 16             # sequence length (<= block)
HIDDEN = 4 * EMBED   # FFN hidden
LN_EPS = 1e-5
BATCH = 2

# rows of the packed small-vector input
_ROW_G1, _ROW_B1, _ROW_G2, _ROW_B2, _ROW_BP, _ROW_BF2 = range(6)


def _layernorm(h, gamma, beta):
    # one-pass moments: var = E[x^2] - mu^2 (independent lane reductions)
    mu = jnp.mean(h, axis=-1, keepdims=True)
    ms = jnp.mean(h * h, axis=-1, keepdims=True)
    var = ms - mu * mu
    return (h - mu) * jax.lax.rsqrt(var + LN_EPS) * gamma + beta


def block_kernel(x_ref, vecs_ref, bf1_ref,
                 wqkv_ref,                 # fused (E, 3E) bf16, Wq pre-scaled
                 wp3_ref,                  # output proj (H, HS, E) bf16
                 wf1_ref, wf2_ref,         # FFN weights bf16
                 o_ref):
    x = x_ref[...]                         # (BT, E) f32
    BT, E = x.shape
    B = BATCH
    T = BT // B

    vecs = vecs_ref[...]                   # (6, E) f32 packed small vectors
    g1 = vecs[_ROW_G1:_ROW_G1 + 1]
    b1 = vecs[_ROW_B1:_ROW_B1 + 1]
    g2 = vecs[_ROW_G2:_ROW_G2 + 1]
    b2 = vecs[_ROW_B2:_ROW_B2 + 1]
    bp = vecs[_ROW_BP:_ROW_BP + 1]
    bf2 = vecs[_ROW_BF2:_ROW_BF2 + 1]

    # ---------------- self-attention branch ----------------
    xn = _layernorm(x, g1, b1)
    qkv = jnp.dot(xn.astype(jnp.bfloat16), wqkv_ref[...],
                  preferred_element_type=jnp.float32)            # (BT, 3E) f32
    # cast BEFORE the lane-splitting relayout (halves bytes moved through XLU)
    qkv = qkv.astype(jnp.bfloat16)
    qkvh = pltpu.einshape("mhd->hmd",
                          qkv.reshape(BT, 3 * HEAD, HEAD_SIZE))  # (3H, BT, HS) bf16
    # split into q/k/v batched over (head * batch); outer-dim reshapes are free
    q3 = qkvh[0:HEAD].reshape(HEAD * B, T, HEAD_SIZE)
    k3 = qkvh[HEAD:2 * HEAD].reshape(HEAD * B, T, HEAD_SIZE)
    v3 = qkvh[2 * HEAD:3 * HEAD].reshape(HEAD * B, T, HEAD_SIZE)

    # scores: (H*B, T, T); scale already folded into the Wq columns
    scores = jax.lax.dot_general(
        q3, k3, (((2,), (2,)), ((0,), (0,))),
        preferred_element_type=jnp.float32)

    # causal mask built in-kernel (no bias DMA); finite -1e9 is safe because
    # the row-max subtraction below is kept and scores stay f32.
    row = jax.lax.broadcasted_iota(jnp.int32, (T, T), 0)
    col = jax.lax.broadcasted_iota(jnp.int32, (T, T), 1)
    scores = jnp.where(row >= col, scores, -1e9)

    scores = scores - jnp.max(scores, axis=-1, keepdims=True)
    p = jnp.exp(scores)
    p = p * pl.reciprocal(jnp.sum(p, axis=-1, keepdims=True), approx=True)

    # attention output per (head, batch): (H*B, T, HS)
    attn = jax.lax.dot_general(
        p.astype(jnp.bfloat16), v3, (((2,), (1,)), ((0,), (0,))),
        preferred_element_type=jnp.float32)

    # fused "concat + projection": per-head matmul then sum over heads
    attn = attn.astype(jnp.bfloat16).reshape(HEAD, BT, HEAD_SIZE)
    proj = jax.lax.dot_general(
        attn, wp3_ref[...], (((2,), (1,)), ((0,), (0,))),
        preferred_element_type=jnp.float32)                      # (H, BT, E)
    sa = jnp.sum(proj, axis=0) + bp
    # TODO(synk): nn.Dropout(p=0.2) layers implemented as identity (eval semantics).
    x = x + sa

    # ---------------- feed-forward branch ----------------
    xn2 = _layernorm(x, g2, b2)
    h1 = jnp.dot(xn2.astype(jnp.bfloat16), wf1_ref[...],
                 preferred_element_type=jnp.float32) + bf1_ref[...]
    h1 = jnp.maximum(h1, 0.0)                                    # ReLU
    h2 = jnp.dot(h1.astype(jnp.bfloat16), wf2_ref[...],
                 preferred_element_type=jnp.float32) + bf2
    o_ref[...] = x + h2


def prepare_params(params):
    """One-time weight prep (runs once, outside the per-call jitted path)."""
    (g1, b1, wq, wk, wv, wp, bp, g2, b2, wf1, bf1, wf2, bf2) = params
    scale = HEAD_SIZE ** -0.5
    # fused QKV weight with the attention scale folded into the Wq columns
    wqkv = jnp.concatenate([wq * scale, wk, wv], axis=1).astype(jnp.bfloat16)
    wp3 = wp.reshape(HEAD, HEAD_SIZE, EMBED).astype(jnp.bfloat16)
    wf1_b = wf1.astype(jnp.bfloat16)
    wf2_b = wf2.astype(jnp.bfloat16)
    # pack the seven tiny (1, E) vectors into a single VMEM input
    vecs = jnp.concatenate([g1, b1, g2, b2, bp, bf2], axis=0).astype(jnp.float32)
    bf1_f = bf1.astype(jnp.float32)
    return (vecs, bf1_f, wqkv, wp3, wf1_b, wf2_b)


@jax.jit
def transformer_block(x, prepared):
    vecs, bf1, wqkv, wp3, wf1_b, wf2_b = prepared
    B, T, E = x.shape
    x2d = x.reshape(B * T, E)
    vmem = pl.BlockSpec(memory_space=pltpu.MemorySpace.VMEM)

    # Single gridless invocation: total work is tiny, per-step grid overhead
    # would dominate (see header TODO for production-scale tiling).
    out2d = pl.pallas_call(
        block_kernel,
        out_shape=jax.ShapeDtypeStruct((B * T, E), x.dtype),
        in_specs=[vmem] * 7,
        out_specs=vmem,
    )(x2d, vecs, bf1, wqkv, wp3, wf1_b, wf2_b)
    return out2d.reshape(B, T, E)


# ---------------- pure-JAX f32 reference for verification ----------------
def _layernorm_ref(h, gamma, beta):
    mu = jnp.mean(h, axis=-1, keepdims=True)
    var = jnp.mean((h - mu) ** 2, axis=-1, keepdims=True)
    return (h - mu) * jax.lax.rsqrt(var + LN_EPS) * gamma + beta


def reference_block(x, params):
    (g1, b1, wq, wk, wv, wp, bp, g2, b2, wf1, bf1, wf2, bf2) = params
    T = x.shape[1]
    xn = _layernorm_ref(x, g1, b1)
    q, k, v = xn @ wq, xn @ wk, xn @ wv
    causal = jnp.tril(jnp.ones((T, T), dtype=bool))
    outs = []
    for h in range(HEAD):
        sl = slice(h * HEAD_SIZE, (h + 1) * HEAD_SIZE)
        wei = jnp.einsum("btd,bsd->bts", q[..., sl], k[..., sl]) * HEAD_SIZE ** -0.5
        wei = jnp.where(causal, wei, -jnp.inf)
        wei = jax.nn.softmax(wei, axis=-1)
        outs.append(jnp.einsum("bts,bsd->btd", wei, v[..., sl]))
    sa = jnp.concatenate(outs, axis=-1) @ wp + bp
    x = x + sa
    xn2 = _layernorm_ref(x, g2, b2)
    h1 = jnp.maximum(xn2 @ wf1 + bf1, 0.0)
    return x + (h1 @ wf2 + bf2)


def init_params(key):
    ks = jax.random.split(key, 8)
    s = 0.02
    g1 = jnp.ones((1, EMBED), jnp.float32)
    b1 = jnp.zeros((1, EMBED), jnp.float32)
    g2 = jnp.ones((1, EMBED), jnp.float32)
    b2 = jnp.zeros((1, EMBED), jnp.float32)
    wq = s * jax.random.normal(ks[0], (EMBED, EMBED), jnp.float32)
    wk = s * jax.random.normal(ks[1], (EMBED, EMBED), jnp.float32)
    wv = s * jax.random.normal(ks[2], (EMBED, EMBED), jnp.float32)
    wp = s * jax.random.normal(ks[3], (EMBED, EMBED), jnp.float32)
    bp = s * jax.random.normal(ks[4], (1, EMBED), jnp.float32)
    wf1 = s * jax.random.normal(ks[5], (EMBED, HIDDEN), jnp.float32)
    bf1 = jnp.zeros((1, HIDDEN), jnp.float32)
    wf2 = s * jax.random.normal(ks[6], (HIDDEN, EMBED), jnp.float32)
    bf2 = jnp.zeros((1, EMBED), jnp.float32)
    return (g1, b1, wq, wk, wv, wp, bp, g2, b2, wf1, bf1, wf2, bf2)


if __name__ == "__main__":
    key = jax.random.PRNGKey(0)
    kx, kp = jax.random.split(key)
    x = jax.random.normal(kx, (BATCH, SEQ, EMBED), jnp.float32)
    params = init_params(kp)

    prepared = jax.block_until_ready(prepare_params(params))   # one-time prep
    out = jax.block_until_ready(transformer_block(x, prepared))
    ref = reference_block(x, params)

    assert out.shape == x.shape
    # bf16 MXU operands + approx reciprocal vs. f32 reference -> loose tolerance
    assert jnp.allclose(out, ref, atol=2e-2, rtol=2e-2), "mismatch vs reference"
    print("KERNEL_OK")
</pallas_src>

<mosaic_0001>
module attributes {stable_mosaic.version = 11 : i64} {
  func.func @block_kernel(%arg0: memref<32x128xf32, #tpu.memory_space<vmem>>, %arg1: memref<6x128xf32, #tpu.memory_space<vmem>>, %arg2: memref<1x512xf32, #tpu.memory_space<vmem>>, %arg3: memref<128x384xbf16, #tpu.memory_space<vmem>>, %arg4: memref<4x32x128xbf16, #tpu.memory_space<vmem>>, %arg5: memref<128x512xbf16, #tpu.memory_space<vmem>>, %arg6: memref<512x128xbf16, #tpu.memory_space<vmem>>, %arg7: memref<32x128xf32, #tpu.memory_space<vmem>>) attributes {dimension_semantics = [], scalar_prefetch = 0 : i64, scratch_operands = 0 : i64, tpu.core_type = #tpu.core_type<tc>} {
    %c0 = arith.constant 0 : index
    %c0_0 = arith.constant 0 : index
    %0 = vector.load %arg0[%c0, %c0_0] : memref<32x128xf32, #tpu.memory_space<vmem>>, vector<32x128xf32>
    %c0_1 = arith.constant 0 : index
    %c0_2 = arith.constant 0 : index
    %1 = vector.load %arg1[%c0_1, %c0_2] : memref<6x128xf32, #tpu.memory_space<vmem>>, vector<6x128xf32>
    %2 = vector.extract_strided_slice %1 {offsets = [0, 0], sizes = [1, 128], strides = [1, 1]} : vector<6x128xf32> to vector<1x128xf32>
    %3 = vector.extract_strided_slice %1 {offsets = [1, 0], sizes = [1, 128], strides = [1, 1]} : vector<6x128xf32> to vector<1x128xf32>
    %4 = vector.extract_strided_slice %1 {offsets = [2, 0], sizes = [1, 128], strides = [1, 1]} : vector<6x128xf32> to vector<1x128xf32>
    %5 = vector.extract_strided_slice %1 {offsets = [3, 0], sizes = [1, 128], strides = [1, 1]} : vector<6x128xf32> to vector<1x128xf32>
    %6 = vector.extract_strided_slice %1 {offsets = [4, 0], sizes = [1, 128], strides = [1, 1]} : vector<6x128xf32> to vector<1x128xf32>
    %7 = vector.extract_strided_slice %1 {offsets = [5, 0], sizes = [1, 128], strides = [1, 1]} : vector<6x128xf32> to vector<1x128xf32>
    %cst = arith.constant dense<0.000000e+00> : vector<32xf32>
    %8 = vector.multi_reduction <add>, %0, %cst [1] : vector<32x128xf32> to vector<32xf32>
    %9 = vector.shape_cast %8 : vector<32xf32> to vector<32x1xf32>
    %cst_3 = arith.constant 1.280000e+02 : f32
    %10 = vector.broadcast %cst_3 : f32 to vector<32x1xf32>
    %11 = arith.divf %9, %10 : vector<32x1xf32>
    %12 = arith.mulf %0, %0 : vector<32x128xf32>
    %cst_4 = arith.constant dense<0.000000e+00> : vector<32xf32>
    %13 = vector.multi_reduction <add>, %12, %cst_4 [1] : vector<32x128xf32> to vector<32xf32>
    %14 = vector.shape_cast %13 : vector<32xf32> to vector<32x1xf32>
    %cst_5 = arith.constant 1.280000e+02 : f32
    %15 = vector.broadcast %cst_5 : f32 to vector<32x1xf32>
    %16 = arith.divf %14, %15 : vector<32x1xf32>
    %17 = arith.mulf %11, %11 : vector<32x1xf32>
    %18 = arith.subf %16, %17 : vector<32x1xf32>
    %19 = vector.broadcast %11 : vector<32x1xf32> to vector<32x128xf32>
    %20 = arith.subf %0, %19 : vector<32x128xf32>
    %cst_6 = arith.constant 9.99999974E-6 : f32
    %21 = vector.broadcast %cst_6 : f32 to vector<32x1xf32>
    %22 = arith.addf %18, %21 : vector<32x1xf32>
    %23 = math.rsqrt %22 : vector<32x1xf32>
    %24 = vector.broadcast %23 : vector<32x1xf32> to vector<32x128xf32>
    %25 = arith.mulf %20, %24 : vector<32x128xf32>
    %26 = vector.broadcast %2 : vector<1x128xf32> to vector<32x128xf32>
    %27 = arith.mulf %25, %26 : vector<32x128xf32>
    %28 = vector.broadcast %3 : vector<1x128xf32> to vector<32x128xf32>
    %29 = arith.addf %27, %28 : vector<32x128xf32>
    %30 = arith.truncf %29 : vector<32x128xf32> to vector<32x128xbf16>
    %c0_7 = arith.constant 0 : index
    %c0_8 = arith.constant 0 : index
    %31 = vector.load %arg3[%c0_7, %c0_8] : memref<128x384xbf16, #tpu.memory_space<vmem>>, vector<128x384xbf16>
    %cst_9 = arith.constant dense<0.000000e+00> : vector<32x384xf32>
    %32 = tpu.matmul %30, %31, %cst_9 {dimension_numbers = #tpu.dot_dimension_numbers<[1], [0], [0], [1], [0, 0, 1, 1], [], []>} : vector<32x128xbf16>, vector<128x384xbf16>, vector<32x384xf32> -> vector<32x384xf32>
    %33 = arith.truncf %32 : vector<32x384xf32> to vector<32x384xbf16>
    %34 = vector.shape_cast %33 : vector<32x384xbf16> to vector<32x12x32xbf16>
    %35 = tpu.transpose %34, [1, 0, 2] : vector<32x12x32xbf16> -> vector<12x32x32xbf16>
    %36 = vector.extract_strided_slice %35 {offsets = [0, 0, 0], sizes = [4, 32, 32], strides = [1, 1, 1]} : vector<12x32x32xbf16> to vector<4x32x32xbf16>
    %37 = vector.shape_cast %36 : vector<4x32x32xbf16> to vector<8x16x32xbf16>
    %38 = vector.extract_strided_slice %35 {offsets = [4, 0, 0], sizes = [4, 32, 32], strides = [1, 1, 1]} : vector<12x32x32xbf16> to vector<4x32x32xbf16>
    %39 = vector.shape_cast %38 : vector<4x32x32xbf16> to vector<8x16x32xbf16>
    %40 = vector.extract_strided_slice %35 {offsets = [8, 0, 0], sizes = [4, 32, 32], strides = [1, 1, 1]} : vector<12x32x32xbf16> to vector<4x32x32xbf16>
    %41 = vector.shape_cast %40 : vector<4x32x32xbf16> to vector<8x16x32xbf16>
    %cst_10 = arith.constant dense<0.000000e+00> : vector<8x16x16xf32>
    %42 = tpu.matmul %37, %39, %cst_10 {dimension_numbers = #tpu.dot_dimension_numbers<[2], [2], [1], [1], [0, 0, 0, 1, 1, 1], [0], [0]>} : vector<8x16x32xbf16>, vector<8x16x32xbf16>, vector<8x16x16xf32> -> vector<8x16x16xf32>
    %43 = tpu.iota {dimensions = array<i32: 0>} : vector<16x16xi32>
    %44 = tpu.iota {dimensions = array<i32: 1>} : vector<16x16xi32>
    %45 = arith.cmpi sge, %43, %44 : vector<16x16xi32>
    %cst_11 = arith.constant -1.000000e+09 : f32
    %46 = vector.shape_cast %45 : vector<16x16xi1> to vector<1x16x16xi1>
    %47 = vector.broadcast %46 : vector<1x16x16xi1> to vector<8x16x16xi1>
    %48 = vector.broadcast %cst_11 : f32 to vector<8x16x16xf32>
    %49 = arith.select %47, %42, %48 : vector<8x16x16xi1>, vector<8x16x16xf32>
    %cst_12 = arith.constant dense<0xFF800000> : vector<8x16xf32>
    %50 = vector.multi_reduction <maximumf>, %49, %cst_12 [2] : vector<8x16x16xf32> to vector<8x16xf32>
    %51 = vector.shape_cast %50 : vector<8x16xf32> to vector<8x16x1xf32>
    %52 = vector.broadcast %51 : vector<8x16x1xf32> to vector<8x16x16xf32>
    %53 = arith.subf %49, %52 : vector<8x16x16xf32>
    %54 = math.exp %53 : vector<8x16x16xf32>
    %cst_13 = arith.constant dense<0.000000e+00> : vector<8x16xf32>
    %55 = vector.multi_reduction <add>, %54, %cst_13 [2] : vector<8x16x16xf32> to vector<8x16xf32>
    %56 = vector.shape_cast %55 : vector<8x16xf32> to vector<8x16x1xf32>
    %57 = tpu.reciprocal %56 {approx = true} : vector<8x16x1xf32> -> vector<8x16x1xf32>
    %58 = vector.broadcast %57 : vector<8x16x1xf32> to vector<8x16x16xf32>
    %59 = arith.mulf %54, %58 : vector<8x16x16xf32>
    %60 = arith.truncf %59 : vector<8x16x16xf32> to vector<8x16x16xbf16>
    %cst_14 = arith.constant dense<0.000000e+00> : vector<8x16x32xf32>
    %61 = tpu.matmul %60, %41, %cst_14 {dimension_numbers = #tpu.dot_dimension_numbers<[2], [1], [1], [2], [0, 0, 0, 1, 1, 2], [0], [0]>} : vector<8x16x16xbf16>, vector<8x16x32xbf16>, vector<8x16x32xf32> -> vector<8x16x32xf32>
    %62 = arith.truncf %61 : vector<8x16x32xf32> to vector<8x16x32xbf16>
    %63 = vector.shape_cast %62 : vector<8x16x32xbf16> to vector<4x32x32xbf16>
    %c0_15 = arith.constant 0 : index
    %c0_16 = arith.constant 0 : index
    %c0_17 = arith.constant 0 : index
    %64 = vector.load %arg4[%c0_15, %c0_16, %c0_17] : memref<4x32x128xbf16, #tpu.memory_space<vmem>>, vector<4x32x128xbf16>
    %cst_18 = arith.constant dense<0.000000e+00> : vector<4x32x128xf32>
    %65 = tpu.matmul %63, %64, %cst_18 {dimension_numbers = #tpu.dot_dimension_numbers<[2], [1], [1], [2], [0, 0, 0, 1, 1, 2], [0], [0]>} : vector<4x32x32xbf16>, vector<4x32x128xbf16>, vector<4x32x128xf32> -> vector<4x32x128xf32>
    %cst_19 = arith.constant dense<0.000000e+00> : vector<32x128xf32>
    %66 = vector.multi_reduction <add>, %65, %cst_19 [0] : vector<4x32x128xf32> to vector<32x128xf32>
    %67 = vector.broadcast %6 : vector<1x128xf32> to vector<32x128xf32>
    %68 = arith.addf %66, %67 : vector<32x128xf32>
    %69 = arith.addf %0, %68 : vector<32x128xf32>
    %cst_20 = arith.constant dense<0.000000e+00> : vector<32xf32>
    %70 = vector.multi_reduction <add>, %69, %cst_20 [1] : vector<32x128xf32> to vector<32xf32>
    %71 = vector.shape_cast %70 : vector<32xf32> to vector<32x1xf32>
    %cst_21 = arith.constant 1.280000e+02 : f32
    %72 = vector.broadcast %cst_21 : f32 to vector<32x1xf32>
    %73 = arith.divf %71, %72 : vector<32x1xf32>
    %74 = arith.mulf %69, %69 : vector<32x128xf32>
    %cst_22 = arith.constant dense<0.000000e+00> : vector<32xf32>
    %75 = vector.multi_reduction <add>, %74, %cst_22 [1] : vector<32x128xf32> to vector<32xf32>
    %76 = vector.shape_cast %75 : vector<32xf32> to vector<32x1xf32>
    %cst_23 = arith.constant 1.280000e+02 : f32
    %77 = vector.broadcast %cst_23 : f32 to vector<32x1xf32>
    %78 = arith.divf %76, %77 : vector<32x1xf32>
    %79 = arith.mulf %73, %73 : vector<32x1xf32>
    %80 = arith.subf %78, %79 : vector<32x1xf32>
    %81 = vector.broadcast %73 : vector<32x1xf32> to vector<32x128xf32>
    %82 = arith.subf %69, %81 : vector<32x128xf32>
    %cst_24 = arith.constant 9.99999974E-6 : f32
    %83 = vector.broadcast %cst_24 : f32 to vector<32x1xf32>
    %84 = arith.addf %80, %83 : vector<32x1xf32>
    %85 = math.rsqrt %84 : vector<32x1xf32>
    %86 = vector.broadcast %85 : vector<32x1xf32> to vector<32x128xf32>
    %87 = arith.mulf %82, %86 : vector<32x128xf32>
    %88 = vector.broadcast %4 : vector<1x128xf32> to vector<32x128xf32>
    %89 = arith.mulf %87, %88 : vector<32x128xf32>
    %90 = vector.broadcast %5 : vector<1x128xf32> to vector<32x128xf32>
    %91 = arith.addf %89, %90 : vector<32x128xf32>
    %92 = arith.truncf %91 : vector<32x128xf32> to vector<32x128xbf16>
    %c0_25 = arith.constant 0 : index
    %c0_26 = arith.constant 0 : index
    %93 = vector.load %arg5[%c0_25, %c0_26] : memref<128x512xbf16, #tpu.memory_space<vmem>>, vector<128x512xbf16>
    %cst_27 = arith.constant dense<0.000000e+00> : vector<32x512xf32>
    %94 = tpu.matmul %92, %93, %cst_27 {dimension_numbers = #tpu.dot_dimension_numbers<[1], [0], [0], [1], [0, 0, 1, 1], [], []>} : vector<32x128xbf16>, vector<128x512xbf16>, vector<32x512xf32> -> vector<32x512xf32>
    %c0_28 = arith.constant 0 : index
    %c0_29 = arith.constant 0 : index
    %95 = vector.load %arg2[%c0_28, %c0_29] : memref<1x512xf32, #tpu.memory_space<vmem>>, vector<1x512xf32>
    %96 = vector.broadcast %95 : vector<1x512xf32> to vector<32x512xf32>
    %97 = arith.addf %94, %96 : vector<32x512xf32>
    %cst_30 = arith.constant 0.000000e+00 : f32
    %98 = vector.broadcast %cst_30 : f32 to vector<32x512xf32>
    %99 = arith.maximumf %97, %98 : vector<32x512xf32>
    %100 = arith.truncf %99 : vector<32x512xf32> to vector<32x512xbf16>
    %c0_31 = arith.constant 0 : index
    %c0_32 = arith.constant 0 : index
    %101 = vector.load %arg6[%c0_31, %c0_32] : memref<512x128xbf16, #tpu.memory_space<vmem>>, vector<512x128xbf16>
    %cst_33 = arith.constant dense<0.000000e+00> : vector<32x128xf32>
    %102 = tpu.matmul %100, %101, %cst_33 {dimension_numbers = #tpu.dot_dimension_numbers<[1], [0], [0], [1], [0, 0, 1, 1], [], []>} : vector<32x512xbf16>, vector<512x128xbf16>, vector<32x128xf32> -> vector<32x128xf32>
    %103 = vector.broadcast %7 : vector<1x128xf32> to vector<32x128xf32>
    %104 = arith.addf %102, %103 : vector<32x128xf32>
    %105 = arith.addf %69, %104 : vector<32x128xf32>
    %c0_34 = arith.constant 0 : index
    %c0_35 = arith.constant 0 : index
    %106 = vector.load %arg7[%c0_34, %c0_35] : memref<32x128xf32, #tpu.memory_space<vmem>>, vector<32x128xf32>
    tpu.vector_store %arg7[%c0_34, %c0_35], %105 {strides = array<i32>} : memref<32x128xf32, #tpu.memory_space<vmem>>, vector<32x128xf32>,
    return
  }
}

</mosaic_0001>

<bundles_post_ra>
// kernel: transformer_block.1
= control target key start
LH: loop header
LB: loop body
LE: loop exit
PB: predicated region body
PF: predicated region fallthrough
CT: control target
= control target key end

     0   :  { %12 = vsyncpa [#allocation3], 0  ;;  %s5342_s0 = inlined_call_operand.hbm [shape: f32[32,128], index: 0, kind: input, shape index: {}]   ;;  %s5343_s1 = inlined_call_operand.hbm [shape: f32[6,128], index: 1, kind: input, shape index: {}]   ;;  %s5344_s2 = inlined_call_operand.vmem [shape: f32[1,512], index: 2, kind: input, shape index: {}]   ;;  %s5345_s3 = inlined_call_operand.hbm [shape: bf16[128,384], index: 3, kind: input, shape index: {}]   ;;  %s5346_s4 = inlined_call_operand.hbm [shape: bf16[4,32,128], index: 4, kind: input, shape index: {}]   ;;  %s5347_s5 = inlined_call_operand.hbm [shape: bf16[128,512], index: 5, kind: input, shape index: {}]   ;;  %s5348_s6 = inlined_call_operand.hbm [shape: bf16[512,128], index: 6, kind: input, shape index: {}]   ;;  %s5349_s7 = inlined_call_operand.hbm [shape: f32[32,128], index: 7, kind: output, shape index: {}]  }
   0x1   :  { %13 = vsyncpa [#allocation6], 0 }
   0x2   :  { %14 = vsyncpa [#allocation9], 0 }
   0x3   :  { %15 = vsyncpa [#allocation12], 0 }
   0x4   :  { %16 = vsyncpa [#allocation4], 0  ;;  %s4558_s24 = smov [#allocation5]   ;;  %s4559_s26 = smov [#allocation8]  }
   0x5   :  { %s35_s25 = sshll.u32 %s4558_s24, 4  ;;  %s58_s27 = sshll.u32 %s4559_s26, 4  ;;  %s36_s25 = int_to_ptr.vmem [resolvable:$true] %s35_s25  ;;  %s4620_s27 = int_to_ptr.vmem [resolvable:$true] %s58_s27 }
   0x6   :  { %s4394_s30 = scalar_lea.hbm %s5343_s1, 128 }
   0x7   :  { %p4395_p0 = scmp.ne.s32.totalorder %s5343_s1, %s4394_s30  ;;  %p4398_p1 = scmp.lt.u32.totalorder %s4394_s30, %s5343_s1 }
   0x9   :  { %p4400_p2 = pnand %p4398_p1, %p4395_p0 }
   0xb   :  { %4403 = shalt.err (!%p4400_p2)
}
   0xc   :  { %s4404_s12 = scalar_lea.vmem %s36_s25, 128  ;;  %p4409_p4 = scmp.lt.s32.totalorder %s36_s25, %s36_s25 }
   0xd   :  { %p4405_p3 = scmp.ne.s32.totalorder %s36_s25, %s4404_s12  ;;  %p4410_p5 = scmp.lt.s32.totalorder %s4404_s12, %s4404_s12 }
   0xf   :  { %p4411_p6 = por %p4410_p5, %p4409_p4 }
  0x11   :  { %p4412_p7 = pnand %p4411_p6, %p4405_p3 }
  0x13   :  { %4415 = shalt.err (!%p4412_p7)
}
  0x14   :  { %38 = dma.hbm_to_vmem [thread:$0]  %s5343_s1, 128, %s36_s25, [#allocation6]  }
  0x15   :  { %s4416_s17 = scalar_lea.hbm %s5346_s4, 1024 }
  0x16   :  { %p4417_p8 = scmp.ne.s32.totalorder %s5346_s4, %s4416_s17  ;;  %p4420_p9 = scmp.lt.u32.totalorder %s4416_s17, %s5346_s4 }
  0x18   :  { %p4422_p10 = pnand %p4420_p9, %p4417_p8 }
  0x1a   :  { %4425 = shalt.err (!%p4422_p10)
}
  0x1b   :  { %s4426_s22 = scalar_lea.vmem %s4620_s27, 1024  ;;  %p4431_p12 = scmp.lt.s32.totalorder %s4620_s27, %s4620_s27 }
  0x1c   :  { %p4427_p11 = scmp.ne.s32.totalorder %s4620_s27, %s4426_s22  ;;  %p4432_p13 = scmp.lt.s32.totalorder %s4426_s22, %s4426_s22 }
  0x1e   :  { %p4433_p0 = por %p4432_p13, %p4431_p12 }
  0x20   :  { %p4434_p1 = pnand %p4433_p0, %p4427_p11 }
  0x22   :  { %4437 = shalt.err (!%p4434_p1)
}
  0x23   :  { %s4560_s1 = smov 64   ;;  %s4561_s23 = smov 4  }
  0x24   :  { %64 = dma.hbm_to_vmem [thread:$0]  %s5346_s4, 1024, %s4620_s27, [#allocation9], %s4560_s1, %s4560_s1, %s4561_s23  }
  0x25   :  { %s4562_s26 = smov [#allocation2]   ;;  %s4438_s8 = scalar_lea.hbm %s5342_s0, 512 }
  0x26   :  { %s22_s28 = sshll.u32 %s4562_s26, 4  ;;  %p4439_p2 = scmp.ne.s32.totalorder %s5342_s0, %s4438_s8  ;;  %s23_s28 = int_to_ptr.vmem [resolvable:$true] %s22_s28 }
  0x27   :  { %p4442_p3 = scmp.lt.u32.totalorder %s4438_s8, %s5342_s0 }
  0x29   :  { %p4444_p4 = pnand %p4442_p3, %p4439_p2 }
  0x2b   :  { %4447 = shalt.err (!%p4444_p4)
}
  0x2c   :  { %s4448_s13 = scalar_lea.vmem %s23_s28, 512  ;;  %p4453_p6 = scmp.lt.s32.totalorder %s23_s28, %s23_s28 }
  0x2d   :  { %p4449_p5 = scmp.ne.s32.totalorder %s23_s28, %s4448_s13  ;;  %p4454_p7 = scmp.lt.s32.totalorder %s4448_s13, %s4448_s13 }
  0x2f   :  { %p4455_p8 = por %p4454_p7, %p4453_p6 }
  0x31   :  { %p4456_p9 = pnand %p4455_p8, %p4449_p5 }
  0x33   :  { %4459 = shalt.err (!%p4456_p9)
}
  0x34   :  { %s4563_s4 = smov 128   ;;  %s4564_s27 = smov 8  }
  0x35   :  { %28 = dma.hbm_to_vmem [thread:$0]  %s5342_s0, 512, %s23_s28, [#allocation3], %s4563_s4, %s4563_s4, %s4564_s27  }
  0x36   :  { %s4565_s16 = smov [#allocation7]   ;;  %s4460_s20 = scalar_lea.hbm %s5345_s3, 3072 }
  0x37   :  { %s46_s17 = sshll.u32 %s4565_s16, 4  ;;  %p4461_p10 = scmp.ne.s32.totalorder %s5345_s3, %s4460_s20  ;;  %s47_s17 = int_to_ptr.vmem [resolvable:$true] %s46_s17 }
  0x38   :  { %p4464_p11 = scmp.lt.u32.totalorder %s4460_s20, %s5345_s3 }
  0x3a   :  { %p4466_p12 = pnand %p4464_p11, %p4461_p10 }
  0x3c   :  { %4469 = shalt.err (!%p4466_p12)
}
  0x3d   :  { %s4470_s26 = scalar_lea.vmem %s47_s17, 3072  ;;  %p4475_p0 = scmp.lt.s32.totalorder %s47_s17, %s47_s17 }
  0x3e   :  { %p4471_p13 = scmp.ne.s32.totalorder %s47_s17, %s4470_s26  ;;  %p4476_p1 = scmp.lt.s32.totalorder %s4470_s26, %s4470_s26 }
  0x40   :  { %p4477_p2 = por %p4476_p1, %p4475_p0 }
  0x42   :  { %p4478_p3 = pnand %p4477_p2, %p4471_p13 }
  0x44   :  { %4481 = shalt.err (!%p4478_p3)
}
  0x45   :  { %s4566_s0 = smov 192   ;;  %s4567_s28 = smov 12  }
  0x46   :  { %52 = dma.hbm_to_vmem [thread:$0]  %s5345_s3, 3072, %s47_s17, [#allocation6], %s4566_s0, %s4566_s0, %s4567_s28  }
  0x47   :  { %s4568_s8 = smov [#allocation10]   ;;  %s4482_s12 = scalar_lea.hbm %s5347_s5, 4096 }
  0x48   :  { %s70_s9 = sshll.u32 %s4568_s8, 4  ;;  %p4483_p4 = scmp.ne.s32.totalorder %s5347_s5, %s4482_s12  ;;  %s71_s9 = int_to_ptr.vmem [resolvable:$true] %s70_s9 }
  0x49   :  { %p4486_p5 = scmp.lt.u32.totalorder %s4482_s12, %s5347_s5 }
  0x4b   :  { %p4488_p6 = pnand %p4486_p5, %p4483_p4 }
  0x4d   :  { %4491 = shalt.err (!%p4488_p6)
}
  0x4e   :  { %s4492_s18 = scalar_lea.vmem %s71_s9, 4096  ;;  %p4497_p8 = scmp.lt.s32.totalorder %s71_s9, %s71_s9 }
  0x4f   :  { %p4493_p7 = scmp.ne.s32.totalorder %s71_s9, %s4492_s18  ;;  %p4498_p9 = scmp.lt.s32.totalorder %s4492_s18, %s4492_s18 }
  0x51   :  { %p4499_p10 = por %p4498_p9, %p4497_p8 }
  0x53   :  { %p4500_p11 = pnand %p4499_p10, %p4493_p7 }
  0x55   :  { %4503 = shalt.err (!%p4500_p11)
}
  0x56   :  { %s4569_s3 = smov 256   ;;  %s4570_s17 = smov 16  }
  0x57   :  { %76 = dma.hbm_to_vmem [thread:$0]  %s5347_s5, 4096, %s71_s9, [#allocation9], %s4569_s3, %s4569_s3, %s4570_s17  }
  0x58   :  { %s4571_s21 = smov [#allocation11]   ;;  %s4504_s26 = scalar_lea.hbm %s5348_s6, 4096 }
  0x59   :  { %s82_s22 = sshll.u32 %s4571_s21, 4  ;;  %p4505_p12 = scmp.ne.s32.totalorder %s5348_s6, %s4504_s26  ;;  %s83_s22 = int_to_ptr.vmem [resolvable:$true] %s82_s22 }
  0x5a   :  { %p4508_p13 = scmp.lt.u32.totalorder %s4504_s26, %s5348_s6 }
  0x5c   :  { %p4510_p0 = pnand %p4508_p13, %p4505_p12 }
  0x5e   :  { %4513 = shalt.err (!%p4510_p0)
}
  0x5f   :  { %s4514_s8 = scalar_lea.vmem %s83_s22, 4096  ;;  %p4519_p2 = scmp.lt.s32.totalorder %s83_s22, %s83_s22 }
  0x60   :  { %p4515_p1 = scmp.ne.s32.totalorder %s83_s22, %s4514_s8  ;;  %p4520_p3 = scmp.lt.s32.totalorder %s4514_s8, %s4514_s8 }
  0x62   :  { %p4521_p4 = por %p4520_p3, %p4519_p2 }
  0x64   :  { %p4522_p5 = pnand %p4521_p4, %p4515_p1 }
  0x66   :  { %4525 = shalt.err (!%p4522_p5)
}
  0x67   :  { %88 = dma.hbm_to_vmem [thread:$0]  %s5348_s6, 4096, %s83_s22, [#allocation12], %s4560_s1, %s4560_s1, %s4561_s23  }
  0x68   :  { %4548 = dma.done.wait [#allocation3], 512  }
  0x69   :  { %4549 = vsyncadd [#allocation3], 4294966784 }
  0x6a   :  { %4550 = dma.done.wait [#allocation6], 3200  }
  0x6b   :  { %4551 = vsyncadd [#allocation6], 4294964096 }
  0x6c   :  { %4552 = dma.done.wait [#allocation9], 5120  }
  0x6d   :  { %4553 = vsyncadd [#allocation9], 4294962176 }
  0x6e   :  { %4554 = dma.done.wait [#allocation12], 4096  }
  0x6f   :  { %4555 = vsyncadd [#allocation12], 4294963200  ;;  %v4708_v0 = vld [vmem:[#allocation2] sm:$0xff]  ;;  %v4710_v1 = vld [vmem:[#allocation2 + $0x8] sm:$0xff]  ;;  %v4572_v30 = vmov 0   ;;  %v166_v46 = vlaneseq  ;;  %s4573_s6 = smov 96  }
  0x70   :  { %113 = vadd.xlane.f32.xlu0 %v4708_v0  ;;  %v126_v2 = vmul.f32 %v4708_v0, %v4708_v0  ;;  %v4189_v3 = vld [vmem:[#allocation7 + $0x4] ss:$12 sps:$4 sm:$0xff]   ;;  %v127_v4 = vmul.f32 %v4710_v1, %v4710_v1  ;;  %v4717_v5 = vld [vmem:[#allocation2 + $0x10] sm:$0xff]  ;;  %v4195_v12 = vld [vmem:[#allocation7 + $0x34] ss:$12 sps:$4 sm:$0xff]   ;;  %376 = vmatprep.mubr.bf16.mxu0 %v4572_v30  ;;  %s4574_s23 = smov 32  }
  0x71   :  { %344 = vmatprep.subr.bf16.mxu0 %v4189_v3  ;;  %v4720_v6 = vld [vmem:[#allocation2 + $0x18] sm:$0xff]  ;;  %v128_v7 = vmul.f32 %v4717_v5, %v4717_v5  ;;  %v4191_v9 = vld [vmem:[#allocation7] ss:$12 sps:$4 sm:$0xff]   ;;  %v4192_v10 = vld [vmem:[#allocation7 + $0x1c] ss:$12 sps:$4 sm:$0xff]   ;;  %v4730_v54 = vshrl.u32 %v166_v46, 7 }
  0x72   :  { %130 = vadd.xlane.f32.xlu1 %v126_v2  ;;  %v129_v8 = vmul.f32 %v4720_v6, %v4720_v6  ;;  %345 = vmatpush1.bf16.msra.mxu0 %v4191_v9  ;;  %v4194_v11 = vld [vmem:[#allocation7 + $0x18] ss:$12 sps:$4 sm:$0xff]   ;;  %v4197_v13 = vld [vmem:[#allocation7 + $0x8] ss:$12 sps:$4 sm:$0xff]   ;;  %v4198_v14 = vld [vmem:[#allocation7 + $0x30] ss:$12 sps:$4 sm:$0xff]  }
  0x73   :  { %346 = vmatprep.subr.bf16.mxu0 %v4192_v10  ;;  %4007 = vmatprep.subr.bf16.mxu1 %v4197_v13  ;;  %v4199_v15 = vld [vmem:[#allocation7 + $0x4c] ss:$12 sps:$4 sm:$0xff]   ;;  %v4202_v17 = vld [vmem:[#allocation7 + $0x48] ss:$12 sps:$4 sm:$0xff]   ;;  %v4203_v18 = vld [vmem:[#allocation7 + $0x64] ss:$12 sps:$4 sm:$0xff]  }
  0x74   :  { %115 = vadd.xlane.f32.xlu0 %v4710_v1  ;;  %4008 = vmatpush3.bf16.msra.mxu1 %v4197_v13  ;;  %v4201_v16 = vld [vmem:[#allocation7 + $0x20] ss:$12 sps:$4 sm:$0xff]   ;;  %v4205_v19 = vld [vmem:[#allocation7 + $0x38] ss:$12 sps:$4 sm:$0xff]   ;;  %v4207_v21 = vld [vmem:[#allocation7 + $0x7c] ss:$12 sps:$4 sm:$0xff]  }
  0x75   :  { %4009 = vmatprep.subr.bf16.mxu1 %v4201_v16  ;;  %v4206_v20 = vld [vmem:[#allocation7 + $0x60] ss:$12 sps:$4 sm:$0xff]   ;;  %v4209_v22 = vld [vmem:[#allocation7 + $0x50] ss:$12 sps:$4 sm:$0xff]   ;;  %v4210_v23 = vld [vmem:[#allocation7 + $0x78] ss:$12 sps:$4 sm:$0xff]  }
  0x76   :  { %132 = vadd.xlane.f32.xlu1 %v127_v4  ;;  %347 = vmatpush1.bf16.msra.mxu0 %v4194_v11  ;;  %v4211_v24 = vld [vmem:[#allocation7 + $0x94] ss:$12 sps:$4 sm:$0xff]   ;;  %v4214_v26 = vld [vmem:[#allocation7 + $0x90] ss:$12 sps:$4 sm:$0xff]   ;;  %v4215_v27 = vld [vmem:[#allocation7 + $0xac] ss:$12 sps:$4 sm:$0xff]  }
  0x77   :  { %348 = vmatprep.subr.bf16.mxu0 %v4195_v12  ;;  %v4213_v25 = vld [vmem:[#allocation7 + $0x68] ss:$12 sps:$4 sm:$0xff]   ;;  %v4217_v28 = vld [vmem:[#allocation7 + $0x80] ss:$12 sps:$4 sm:$0xff]   ;;  %v4219_v31 = vld [vmem:[#allocation7 + $0x98] ss:$12 sps:$4 sm:$0xff]  }
  0x78   :  { %117 = vadd.xlane.f32.xlu0 %v4717_v5  ;;  %4010 = vmatpush3.bf16.msra.mxu1 %v4201_v16  ;;  %v4218_v29 = vld [vmem:[#allocation7 + $0xa8] ss:$12 sps:$4 sm:$0xff]   ;;  %v4220_v32 = vld [vmem:[#allocation7 + $0xb0] ss:$12 sps:$4 sm:$0xff]   ;;  %v168_v60 = vsub.s32 0, %v4730_v54  ;;  %v176_v9 = vsub.s32 1, %v4730_v54 }
  0x79   :  { %4011 = vmatprep.subr.bf16.mxu1 %v4205_v19  ;;  %v112_v63 = vld [vmem:[#allocation5] sm:$0x3f]  ;;  %vm4576_vm0 = vmmov 0   ;;  %vm1684_vm1 = vcmask 261120   ;;  %vm2088_vm3 = vcmask 130048  }
  0x7a   :  { %119 = vadd.xlane.f32.xlu1 %v4720_v6  ;;  %349 = vmatpush1.bf16.msra.mxu0 %v4198_v14  ;;  %v177_v14 = vrot.slane %v112_v63, %v176_v9 }
  0x7b   :  { %350 = vmatprep.subr.bf16.mxu0 %v4199_v15 }
  0x7c   :  { %134 = vadd.xlane.f32.xlu0 %v128_v7  ;;  %4012 = vmatpush3.bf16.msra.mxu1 %v4205_v19 }
  0x7d   :  { %4013 = vmatprep.subr.bf16.mxu1 %v4209_v22 }
  0x7e   :  { %136 = vadd.xlane.f32.xlu1 %v129_v8  ;;  %351 = vmatpush1.bf16.msra.mxu0 %v4202_v17  ;;  %v169_v8 = vrot.slane %v112_v63, %v168_v60 }
  0x7f   :  { %352 = vmatprep.subr.bf16.mxu0 %v4203_v18 }
  0x80   :  { %4014 = vmatpush3.bf16.msra.mxu1 %v4209_v22 }
  0x81   :  { %4015 = vmatprep.subr.bf16.mxu1 %v4213_v25 }
  0x82   :  { %353 = vmatpush1.bf16.msra.mxu0 %v4206_v20 }
  0x83   :  { %354 = vmatprep.subr.bf16.mxu0 %v4207_v21 }
  0x84   :  { %4016 = vmatpush3.bf16.msra.mxu1 %v4213_v25 }
  0x85   :  { %4017 = vmatprep.subr.bf16.mxu1 %v4217_v28 }
  0x86   :  { %355 = vmatpush1.bf16.msra.mxu0 %v4210_v23 }
  0x87   :  { %356 = vmatprep.subr.bf16.mxu0 %v4211_v24 }
  0x88   :  { %4018 = vmatpush3.bf16.msra.mxu1 %v4217_v28 }
  0x89   :  { %4019 = vmatprep.subr.bf16.mxu1 %v4219_v31 }
  0x8a   :  { %357 = vmatpush1.bf16.msra.mxu0 %v4214_v26 }
  0x8b   :  { %358 = vmatprep.subr.bf16.mxu0 %v4215_v27 }
  0x8c   :  { %4020 = vmatpush3.bf16.msra.mxu1 %v4219_v31 }
  0x8d   :  { %4021 = vmatprep.subr.bf16.mxu1 %v4220_v32 }
  0x8e   :  { %359 = vmatpush1.bf16.msra.mxu0 %v4218_v29 }
  0x90   :  { %4022 = vmatpush3.bf16.msra.mxu1 %v4220_v32 }
  0xfd   :  { %v114_v33 = vpop.xlane.xlu0 %113 }
  0xfe   :  { %v122_v34 = vmul.f32 0.0078125, %v114_v33 }
  0xff   :  { %v131_v35 = vpop.xlane.xlu1 %130 }
 0x100   :  { %v142_v36 = vmul.f32 %v122_v34, %v122_v34  ;;  %v138_v37 = vmul.f32 0.0078125, %v131_v35  ;;  %v150_v2 = vsub.f32 %v4708_v0, %v122_v34 }
 0x101   :  { %v116_v38 = vpop.xlane.xlu0 %115 }
 0x102   :  { %v146_v39 = vsub.f32 %v138_v37, %v142_v36  ;;  %v123_v40 = vmul.f32 0.0078125, %v116_v38 }
 0x103   :  { %v133_v41 = vpop.xlane.xlu1 %132 }
 0x104   :  { %v154_v42 = vadd.f32 1e-05, %v146_v39  ;;  %v143_v43 = vmul.f32 %v123_v40, %v123_v40  ;;  %v139_v44 = vmul.f32 0.0078125, %v133_v41  ;;  %v151_v10 = vsub.f32 %v4710_v1, %v123_v40 }
 0x105   :  { %v118_v45 = vpop.xlane.xlu0 %117 }
 0x106   :  { %4309 = vrsqrt.f32 %v154_v42  ;;  %v147_v47 = vsub.f32 %v139_v44, %v143_v43  ;;  %v124_v48 = vmul.f32 0.0078125, %v118_v45  ;;  %v4575_v45 = vmov 0.0  }
 0x107   :  { %v120_v49 = vpop.xlane.xlu1 %119  ;;  %4027 = vmatprep.subr.bf16.mxu0 %v4575_v45  ;;  %4039 = vmatprep.subr.bf16.mxu1 %v4575_v45 }
 0x108   :  { %v155_v50 = vadd.f32 1e-05, %v147_v47  ;;  %v144_v51 = vmul.f32 %v124_v48, %v124_v48  ;;  %v125_v52 = vmul.f32 0.0078125, %v120_v49  ;;  %v152_v0 = vsub.f32 %v4717_v5, %v124_v48 }
 0x109   :  { %v135_v53 = vpop.xlane.xlu0 %134  ;;  %v4577_v49 = vmov 1983009808  }
 0x10a   :  { %4311 = vrsqrt.f32 %v155_v50  ;;  %v145_v55 = vmul.f32 %v125_v52, %v125_v52  ;;  %v140_v56 = vmul.f32 0.0078125, %v135_v53  ;;  %v153_v19 = vsub.f32 %v4720_v6, %v125_v52 }
 0x10b   :  { %v137_v57 = vpop.xlane.xlu1 %136  ;;  %v599_v50 = vunpack.c.l.s4 %v4577_v49  ;;  %v4578_v53 = vmov 1934713408  }
 0x10c   :  { %v148_v58 = vsub.f32 %v140_v56, %v144_v51  ;;  %v141_v59 = vmul.f32 0.0078125, %v137_v57 }
 0x10d   :  { %v600_v56 = vunpack.c.0.s8 %v599_v50 }
 0x10e   :  { %v156_v61 = vadd.f32 1e-05, %v148_v58  ;;  %v149_v62 = vsub.f32 %v141_v59, %v145_v55  ;;  %v661_v55 = vunpack.c.l.s4 %v4578_v53 }
 0x110   :  { %v4310_v3 = vpop.eup %4309  ;;  %4313 = vrsqrt.f32 %v156_v61  ;;  %v157_v4 = vadd.f32 1e-05, %v149_v62  ;;  %v662_v62 = vunpack.c.0.s8 %v661_v55 }
 0x111   :  { %v162_v7 = vmul.f32 %v4310_v3, %v150_v2 }
 0x112   :  { %4315 = vrsqrt.f32 %v157_v4  ;;  %v4782_v4 = vsub.s32 %v600_v56, %v4730_v54 }
 0x113   :  { %v170_v13 = vmul.f32 %v169_v8, %v162_v7 }
 0x114   :  { %v4312_v11 = vpop.eup %4311 }
 0x115   :  { %v163_v12 = vmul.f32 %v4312_v11, %v151_v10  ;;  %v178_v16 = vadd.f32 %v177_v14, %v170_v13 }
 0x117   :  { %v171_v15 = vmul.f32 %v169_v8, %v163_v12 }
 0x119   :  { %v179_v17 = vadd.f32 %v177_v14, %v171_v15 }
 0x11a   :  { %v4314_v18 = vpop.eup %4313 }
 0x11b   :  { %v182_v20 = vpack.c.bf16 %v179_v17, %v178_v16  ;;  %v164_v21 = vmul.f32 %v4314_v18, %v152_v0  ;;  %v4786_v18 = vsub.s32 %v662_v62, %v4730_v54 }
 0x11c   :  { %v4316_v22 = vpop.eup %4315 }
 0x11d   :  { %377 = vmatmul.mubr.bf16.vlgmr.msra.gmra.mrb[0].mxu0 %v182_v20  ;;  %4023 = vmatprep.mubr.bf16.mxu1 %v182_v20  ;;  %v165_v1 = vmul.f32 %v4316_v22, %v153_v19  ;;  %v172_v23 = vmul.f32 %v169_v8, %v164_v21 }
 0x11e   :  { %386 = vmatprep.mubr.bf16.mxu0 %v4572_v30 }
 0x11f   :  { %v173_v24 = vmul.f32 %v169_v8, %v165_v1  ;;  %v180_v25 = vadd.f32 %v177_v14, %v172_v23 }
 0x121   :  { %v181_v26 = vadd.f32 %v177_v14, %v173_v24 }
 0x123   :  { %v183_v27 = vpack.c.bf16 %v181_v26, %v180_v25 }
 0x125   :  { %387 = vmatmul.mubr.bf16.gmra.mrb[4].mxu0 %v183_v27  ;;  %4024 = vmatmul.mubr.bf16.vlgmr.msra.gmra.mrb[0].mxu1 %v183_v27 }
 0x126   :  { %4029 = vmatprep.mubr.msk.bf16.mxu0 %vm4576_vm0, %v4575_v45  ;;  %4041 = vmatprep.mubr.msk.bf16.mxu1 %vm4576_vm0, %v4575_v45 }
 0x1f0   :  { %v378_v5 = vpop.f32.mrb[0].mxu0 }
 0x1f1   :  { %v380_v28 = vpop.f32.mrb[1].mxu0 }
 0x1f2   :  { %v382_v29 = vpop.f32.mrb[2].mxu0 }
 0x1f3   :  { %v4743_v31 = vpack.c.bf16 %v382_v29, %v378_v5  ;;  %v384_v6 = vpop.f32.mrb[3].mxu0 }
 0x1f4   :  { %v447_v32 = vpack.c.bf16 %v384_v6, %v380_v28 }
 0x1f5   :  { %458 = vrot.lane.b32.xlu1 %v4743_v31, %s4560_s1  ;;  %454 = vrot.lane.b32.xlu0 %v4743_v31, %s4573_s6  ;;  %v498_v7 = vshrl.u32 %v4743_v31, 16 }
 0x1f6   :  { %v514_v3 = vshrl.u32 %v447_v32, 16 }
 0x1f8   :  { %v388_v33 = vpop.f32.mrb[4].mxu0  ;;  %v4025_v34 = vpop.f32.mrb[0].mxu1 }
 0x1f9   :  { %462 = vrot.lane.b32.xlu1 %v4743_v31, %s4574_s23  ;;  %472 = vrot.lane.b32.xlu0 %v447_v32, %s4560_s1  ;;  %v390_v35 = vpop.f32.mrb[5].mxu0  ;;  %v431_v36 = vpop.f32.mrb[1].mxu1 }
 0x1fa   :  { %v392_v37 = vpop.f32.mrb[6].mxu0  ;;  %v4026_v38 = vpop.f32.mrb[2].mxu1 }
 0x1fb   :  { %v4752_v39 = vpack.c.bf16 %v392_v37, %v388_v33  ;;  %v4754_v40 = vpack.c.bf16 %v4026_v38, %v4025_v34  ;;  %v394_v41 = vpop.f32.mrb[7].mxu0  ;;  %v434_v42 = vpop.f32.mrb[3].mxu1 }
 0x1fc   :  { %v4756_v43 = vpack.c.bf16 %v394_v41, %v390_v35  ;;  %v4758_v44 = vpack.c.bf16 %v434_v42, %v431_v36 }
 0x1fd   :  { %468 = vrot.lane.b32.xlu1 %v447_v32, %s4573_s6  ;;  %456 = vrot.lane.b32.xlu0 %v4752_v39, %s4573_s6  ;;  %v552_v33 = vshrl.u32 %v4752_v39, 16 }
 0x1fe   :  { %v568_v35 = vshrl.u32 %v4756_v43, 16 }
 0x201   :  { %476 = vrot.lane.b32.xlu1 %v447_v32, %s4574_s23  ;;  %464 = vrot.lane.b32.xlu0 %v4752_v39, %s4574_s23 }
 0x205   :  { %460 = vrot.lane.b32.xlu1 %v4752_v39, %s4560_s1  ;;  %474 = vrot.lane.b32.xlu0 %v4756_v43, %s4560_s1 }
 0x209   :  { %470 = vrot.lane.b32.xlu1 %v4756_v43, %s4573_s6 }
 0x20d   :  { %478 = vrot.lane.b32.xlu1 %v4756_v43, %s4574_s23 }
 0x267   :  { %v455_v47 = vpop.permute.xlu0 %454  ;;  %v459_v48 = vpop.permute.xlu1 %458 }
 0x268   :  { %v496_v63 = vpack.i.b16 %v455_v47, %v4743_v31  ;;  %v499_v2 = vshrl.u32 %v455_v47, 16  ;;  %v506_v11 = vshrl.u32 %v459_v48, 16 }
 0x26a   :  { %v500_v19 = vpack.i.b16 %v499_v2, %v498_v7 }
 0x26b   :  { %v473_v51 = vpop.permute.xlu0 %472  ;;  %v463_v52 = vpop.permute.xlu1 %462 }
 0x26c   :  { %v507_v8 = vshrl.u32 %v463_v52, 16  ;;  %v522_v15 = vshrl.u32 %v473_v51, 16  ;;  %v504_v0 = vpack.i.b16 %v463_v52, %v459_v48 }
 0x26e   :  { %v508_v20 = vpack.i.b16 %v507_v8, %v506_v11 }
 0x26f   :  { %v469_v57 = vpop.permute.xlu1 %468  ;;  %v457_v61 = vpop.permute.xlu0 %456 }
 0x270   :  { %v512_v58 = vpack.i.b16 %v469_v57, %v447_v32  ;;  %v515_v59 = vshrl.u32 %v469_v57, 16  ;;  %v550_v32 = vpack.i.b16 %v457_v61, %v4752_v39  ;;  %v553_v34 = vshrl.u32 %v457_v61, 16 }
 0x272   :  { %v516_v12 = vpack.i.b16 %v515_v59, %v514_v3  ;;  %v596_v13 = vcombine.low %v496_v63, %v512_v58  ;;  %v597_v14 = vcombine.high %v496_v63, %v512_v58  ;;  %v554_v61 = vpack.i.b16 %v553_v34, %v552_v33 }
 0x273   :  { %v477_v10 = vpop.permute.xlu1 %476  ;;  %v4788_v21 = vpop.permute.xlu0 %464 }
 0x274   :  { %v520_v16 = vpack.i.b16 %v477_v10, %v473_v51  ;;  %v523_v17 = vshrl.u32 %v477_v10, 16  ;;  %v604_v25 = vrot.slane %v596_v13, %v4782_v4  ;;  %v611_v26 = vrot.slane %v597_v14, %v4782_v4 }
 0x275   :  { %v730_v27 = vcombine.low %v500_v19, %v516_v12  ;;  %v731_v5 = vcombine.high %v500_v19, %v516_v12  ;;  %v561_v62 = vshrl.u32 %v4788_v21, 16 }
 0x276   :  { %v524_v22 = vpack.i.b16 %v523_v17, %v522_v15  ;;  %v612_v1 = vcombine.low %v504_v0, %v520_v16  ;;  %v613_v23 = vcombine.high %v504_v0, %v520_v16 }
 0x277   :  { %v4790_v24 = vpop.permute.xlu1 %460  ;;  %v738_v47 = vrot.slane %v730_v27, %v4782_v4  ;;  %v745_v48 = vrot.slane %v731_v5, %v4782_v4  ;;  %v475_v52 = vpop.permute.xlu0 %474 }
 0x278   :  { %v620_v28 = vrot.slane %v612_v1, %v4782_v4  ;;  %v627_v29 = vrot.slane %v613_v23, %v4782_v4  ;;  %v746_v31 = vcombine.low %v508_v20, %v524_v22  ;;  %v747_v6 = vcombine.high %v508_v20, %v524_v22 }
 0x279   :  { %v576_v11 = vshrl.u32 %v475_v52, 16  ;;  %v558_v16 = vpack.i.b16 %v4788_v21, %v4790_v24  ;;  %v560_v17 = vshrl.u32 %v4790_v24, 16 }
 0x27a   :  { %v658_v36 = vcombine.low %v604_v25, %v620_v28  ;;  %v659_v37 = vcombine.high %v604_v25, %v620_v28  ;;  %v674_v38 = vcombine.low %v611_v26, %v627_v29  ;;  %v675_v41 = vcombine.high %v611_v26, %v627_v29 }
 0x27b   :  { %v471_v42 = vpop.permute.xlu1 %470  ;;  %v754_v49 = vrot.slane %v746_v31, %v4782_v4  ;;  %v761_v50 = vrot.slane %v747_v6, %v4782_v4  ;;  %v562_v34 = vpack.i.b16 %v561_v62, %v560_v17 }
 0x27c   :  { %v666_v51 = vrot.slane %v658_v36, %v4786_v18  ;;  %v673_v39 = vrot.slane %v659_v37, %v4786_v18  ;;  %v566_v53 = vpack.i.b16 %v471_v42, %v4756_v43  ;;  %v569_v55 = vshrl.u32 %v471_v42, 16 }
 0x27d   :  { %v682_v56 = vrot.slane %v674_v38, %v4786_v18  ;;  %v689_v57 = vrot.slane %v675_v41, %v4786_v18  ;;  %v792_v58 = vcombine.low %v738_v47, %v754_v49  ;;  %v793_v59 = vcombine.high %v738_v47, %v754_v49 }
 0x27e   :  { %v808_v63 = vcombine.low %v745_v48, %v761_v50  ;;  %v809_v2 = vcombine.high %v745_v48, %v761_v50  ;;  %v3765_v10 = vcombine.low %v666_v51, %v673_v39  ;;  %v570_v43 = vpack.i.b16 %v569_v55, %v568_v35 }
 0x27f   :  { %v479_v3 = vpop.permute.xlu1 %478  ;;  %v800_v7 = vrot.slane %v792_v58, %v4786_v18  ;;  %v807_v8 = vrot.slane %v793_v59, %v4786_v18  ;;  %v864_v12 = vcombine.low %v550_v32, %v566_v53  ;;  %v865_v13 = vcombine.high %v550_v32, %v566_v53 }
 0x280   :  { %v574_v14 = vpack.i.b16 %v479_v3, %v475_v52  ;;  %v3767_v15 = vcombine.high %v666_v51, %v673_v39  ;;  %v3769_v0 = vcombine.low %v682_v56, %v689_v57  ;;  %v816_v19 = vrot.slane %v808_v63, %v4786_v18 }
 0x281   :  { %v823_v20 = vrot.slane %v809_v2, %v4786_v18  ;;  %v3771_v22 = vcombine.high %v682_v56, %v689_v57  ;;  %v3773_v1 = vcombine.low %v800_v7, %v807_v8  ;;  %v872_v23 = vrot.slane %v864_v12, %v4782_v4 }
 0x282   :  { %v577_v25 = vshrl.u32 %v479_v3, 16  ;;  %v880_v26 = vcombine.low %v558_v16, %v574_v14  ;;  %v881_v27 = vcombine.high %v558_v16, %v574_v14  ;;  %v879_v5 = vrot.slane %v865_v13, %v4782_v4 }
 0x283   :  { %v998_v28 = vcombine.low %v554_v61, %v570_v43  ;;  %v999_v29 = vcombine.high %v554_v61, %v570_v43  ;;  %v4819_v31 = vrot.slane %v3765_v10, %v4782_v4  ;;  %v1156_v32 = vrot.slane %v3767_v15, %v4782_v4 }
 0x284   :  { %v578_v21 = vpack.i.b16 %v577_v25, %v576_v11  ;;  %v888_v24 = vrot.slane %v880_v26, %v4782_v4  ;;  %v895_v6 = vrot.slane %v881_v27, %v4782_v4  ;;  %v3775_v33 = vcombine.high %v800_v7, %v807_v8 }
 0x285   :  { %v4825_v35 = vrot.slane %v3769_v0, %v4782_v4  ;;  %v4828_v36 = vrot.slane %v3771_v22, %v4782_v4  ;;  %v3777_v47 = vcombine.low %v816_v19, %v823_v20  ;;  %v3779_v48 = vcombine.high %v816_v19, %v823_v20 }
 0x286   :  { %v926_v37 = vcombine.low %v872_v23, %v888_v24  ;;  %v927_v38 = vcombine.high %v872_v23, %v888_v24  ;;  %v942_v41 = vcombine.low %v879_v5, %v895_v6  ;;  %v943_v42 = vcombine.high %v879_v5, %v895_v6 }
 0x287   :  { %v1014_v49 = vcombine.low %v562_v34, %v578_v21  ;;  %v1015_v50 = vcombine.high %v562_v34, %v578_v21  ;;  %v1006_v51 = vrot.slane %v998_v28, %v4782_v4  ;;  %v1013_v39 = vrot.slane %v999_v29, %v4782_v4 }
 0x288   :  { %v1197_v52 = vcombine.high %v4819_v31, %v1156_v32  ;;  %v1258_v53 = vrot.slane %v3773_v1, %v4782_v4  ;;  %v934_v55 = vrot.slane %v926_v37, %v4786_v18  ;;  %v941_v56 = vrot.slane %v927_v38, %v4786_v18 }
 0x289   :  { %v1022_v57 = vrot.slane %v1014_v49, %v4782_v4  ;;  %v1029_v58 = vrot.slane %v1015_v50, %v4782_v4  ;;  %v950_v59 = vrot.slane %v942_v41, %v4786_v18  ;;  %v957_v61 = vrot.slane %v943_v42, %v4786_v18 }
 0x28a   :  { %v1221_v62 = vcombine.high %v4825_v35, %v4828_v36  ;;  %v1274_v63 = vrot.slane %v3775_v33, %v4782_v4  ;;  %v1290_v10 = vrot.slane %v3777_v47, %v4782_v4  ;;  %v1306_v11 = vrot.slane %v3779_v48, %v4782_v4 }
 0x28b   :  { %v1060_v2 = vcombine.low %v1006_v51, %v1022_v57  ;;  %v1061_v3 = vcombine.high %v1006_v51, %v1022_v57  ;;  %v1076_v7 = vcombine.low %v1013_v39, %v1029_v58  ;;  %v1077_v8 = vcombine.high %v1013_v39, %v1029_v58 }
 0x28c   :  { %v3781_v13 = vcombine.low %v934_v55, %v941_v56  ;;  %v1211_v14 = vrot.slane %v1197_v52, %v4786_v18  ;;  %v3783_v15 = vcombine.high %v934_v55, %v941_v56  ;;  %v3785_v0 = vcombine.low %v950_v59, %v957_v61 }
 0x28d   :  { %v1068_v43 = vrot.slane %v1060_v2, %v4786_v18  ;;  %v1075_v12 = vrot.slane %v1061_v3, %v4786_v18  ;;  %v1235_v16 = vrot.slane %v1221_v62, %v4786_v18  ;;  %v1315_v17 = vcombine.high %v1258_v53, %v1274_v63 }
 0x28e   :  { %v1084_v19 = vrot.slane %v1076_v7, %v4786_v18  ;;  %v1091_v20 = vrot.slane %v1077_v8, %v4786_v18  ;;  %v3787_v22 = vcombine.high %v950_v59, %v957_v61  ;;  %v1196_v1 = vcombine.low %v4819_v31, %v1156_v32 }
 0x28f   :  { %v1314_v23 = vcombine.low %v1258_v53, %v1274_v63  ;;  %v1329_v25 = vrot.slane %v1315_v17, %v4786_v18  ;;  %v1338_v26 = vcombine.low %v1290_v10, %v1306_v11  ;;  %v1339_v27 = vcombine.high %v1290_v10, %v1306_v11 }
 0x290   :  { %v3789_v5 = vcombine.low %v1068_v43, %v1075_v12  ;;  %v3791_v28 = vcombine.high %v1068_v43, %v1075_v12  ;;  %v1220_v29 = vcombine.low %v4825_v35, %v4828_v36  ;;  %v1376_v21 = vrot.slane %v3781_v13, %v4782_v4 }
 0x291   :  { %v1246_v24 = vcombine.low %v1211_v14, %v1235_v16  ;;  %v1353_v6 = vrot.slane %v1339_v27, %v4786_v18  ;;  %v1392_v33 = vrot.slane %v3783_v15, %v4782_v4  ;;  %v1408_v34 = vrot.slane %v3785_v0, %v4782_v4 }
 0x292   :  { %v3793_v31 = vcombine.low %v1084_v19, %v1091_v20  ;;  %v3795_v32 = vcombine.high %v1084_v19, %v1091_v20  ;;  %v1424_v37 = vrot.slane %v3787_v22, %v4782_v4  ;;  %v4861_v38 = vrot.slane %v1196_v1, %v4786_v18 }
 0x293   :  { %v1322_v41 = vrot.slane %v1314_v23, %v4786_v18  ;;  %v1346_v35 = vrot.slane %v1338_v26, %v4786_v18  ;;  %v1364_v36 = vcombine.low %v1329_v25, %v1353_v6  ;;  %v1433_v42 = vcombine.high %v1376_v21, %v1392_v33 }
 0x294   :  { %v1457_v47 = vcombine.high %v1408_v34, %v1424_v37  ;;  %v1494_v48 = vrot.slane %v3789_v5, %v4782_v4  ;;  %v1510_v49 = vrot.slane %v3791_v28, %v4782_v4  ;;  %v1228_v50 = vrot.slane %v1220_v29, %v4786_v18 }
 0x295   :  { %v1618_v51 = vpack.i.b16 %v1364_v36, %v1246_v24  ;;  %v1619_v39 = vshrl.u32 %v1246_v24, 16  ;;  %v1620_v52 = vshrl.u32 %v1364_v36, 16  ;;  %v1526_v53 = vrot.slane %v3793_v31, %v4782_v4 }
 0x296   :  { %v1542_v55 = vrot.slane %v3795_v32, %v4782_v4  ;;  %v1362_v58 = vcombine.low %v1322_v41, %v1346_v35  ;;  %v1447_v59 = vrot.slane %v1433_v42, %v4786_v18  ;;  %v1471_v61 = vrot.slane %v1457_v47, %v4786_v18 }
 0x297   :  { %v1689_v56 = vsel %vm1684_vm1, %v1618_v51, 0  ;;  %v1621_v57 = vpack.i.b16 %v1620_v52, %v1619_v39  ;;  %v1551_v62 = vcombine.high %v1494_v48, %v1510_v49  ;;  %v1244_v3 = vcombine.low %v4861_v38, %v1228_v50 }
 0x298   :  { %4028 = vmatpush3.bf16.xpose.msra.mxu0 %v1689_v56  ;;  %v1575_v63 = vcombine.high %v1526_v53, %v1542_v55  ;;  %v1365_v7 = vcombine.high %v1329_v25, %v1353_v6  ;;  %v1550_v8 = vcombine.low %v1494_v48, %v1510_v49  ;;  %v1574_v11 = vcombine.low %v1526_v53, %v1542_v55 }
 0x299   :  { %v1783_v2 = vsel %vm1684_vm1, %v1621_v57, 0  ;;  %4033 = vmatprep.subr.bf16.mxu0 %v4575_v45  ;;  %v1565_v10 = vrot.slane %v1551_v62, %v4786_v18  ;;  %v1608_v12 = vshrl.u32 %v1362_v58, 16  ;;  %v1247_v13 = vcombine.high %v1211_v14, %v1235_v16 }
 0x29a   :  { %4040 = vmatpush3.bf16.xpose.msra.mxu1 %v1783_v2  ;;  %v1589_v43 = vrot.slane %v1575_v63, %v4786_v18  ;;  %v1432_v15 = vcombine.low %v1376_v21, %v1392_v33  ;;  %v1456_v0 = vcombine.low %v1408_v34, %v1424_v37  ;;  %v1482_v17 = vcombine.low %v1447_v59, %v1471_v61 }
 0x29b   :  { %4051 = vmatprep.subr.bf16.mxu1 %v4575_v45  ;;  %v1606_v20 = vpack.i.b16 %v1362_v58, %v1244_v3  ;;  %v1607_v22 = vshrl.u32 %v1244_v3, 16  ;;  %v1624_v1 = vpack.i.b16 %v1365_v7, %v1247_v13  ;;  %v1558_v25 = vrot.slane %v1550_v8, %v4786_v18 }
 0x29c   :  { %v1600_v19 = vcombine.low %v1565_v10, %v1589_v43  ;;  %v1582_v26 = vrot.slane %v1574_v11, %v4786_v18  ;;  %v1440_v14 = vrot.slane %v1432_v15, %v4786_v18  ;;  %v1464_v16 = vrot.slane %v1456_v0, %v4786_v18 }
 0x29d   :  { %v1609_v27 = vpack.i.b16 %v1608_v12, %v1607_v22  ;;  %v1877_v29 = vsel %vm1684_vm1, %v1624_v1, 0  ;;  %v1626_v21 = vshrl.u32 %v1365_v7, 16  ;;  %v1659_v6 = vshrl.u32 %v1482_v17, 16 }
 0x29e   :  { %v1658_v23 = vpack.i.b16 %v1600_v19, %v1482_v17  ;;  %v1660_v28 = vshrl.u32 %v1600_v19, 16  ;;  %v1598_v24 = vcombine.low %v1558_v25, %v1582_v26  ;;  %v1363_v33 = vcombine.high %v1322_v41, %v1346_v35 }
 0x29f   :  { %4030 = vmatmul.mubr.msk.bf16.vlgmr.msra.gmra.mrb[8].mxu0 %vm1684_vm1, %v1606_v20  ;;  %v1625_v34 = vshrl.u32 %v1247_v13, 16  ;;  %v1480_v31 = vcombine.low %v1440_v14, %v1464_v16  ;;  %v1245_v37 = vcombine.high %v4861_v38, %v1228_v50  ;;  %v1601_v49 = vcombine.high %v1565_v10, %v1589_v43 }
 0x2a0   :  { %v1736_v5 = vsel %vm1684_vm1, %v1658_v23, 0  ;;  %4035 = vmatprep.mubr.msk.bf16.mxu0 %vm4576_vm0, %v4575_v45  ;;  %v1661_v32 = vpack.i.b16 %v1660_v28, %v1659_v6  ;;  %v1648_v35 = vshrl.u32 %v1598_v24, 16  ;;  %v1483_v51 = vcombine.high %v1447_v59, %v1471_v61 }
 0x2a1   :  { %4042 = vmatmul.mubr.msk.bf16.vlgmr.msra.gmra.mrb[4].mxu1 %vm1684_vm1, %v1609_v27  ;;  %4034 = vmatpush3.bf16.xpose.msra.mxu0 %v1736_v5  ;;  %v1627_v36 = vpack.i.b16 %v1626_v21, %v1625_v34  ;;  %v1646_v42 = vpack.i.b16 %v1598_v24, %v1480_v31  ;;  %v1612_v47 = vpack.i.b16 %v1363_v33, %v1245_v37  ;;  %v1614_v38 = vshrl.u32 %v1363_v33, 16 }
 0x2a2   :  { %4052 = vmatpush3.bf16.xpose.msra.mxu1 %v1877_v29  ;;  %4053 = vmatprep.mubr.msk.bf16.mxu1 %vm4576_vm0, %v4575_v45  ;;  %v1830_v48 = vsel %vm1684_vm1, %v1661_v32, 0  ;;  %v1647_v50 = vshrl.u32 %v1480_v31, 16  ;;  %v1664_v39 = vpack.i.b16 %v1601_v49, %v1483_v51  ;;  %v1613_v52 = vshrl.u32 %v1245_v37, 16 }
 0x2a3   :  { %4063 = vmatprep.subr.bf16.mxu1 %v4575_v45  ;;  %4045 = vmatprep.subr.bf16.mxu0 %v4575_v45  ;;  %v1971_v41 = vsel %vm1684_vm1, %v1627_v36, 0  ;;  %v1666_v57 = vshrl.u32 %v1601_v49, 16  ;;  %v1599_v58 = vcombine.high %v1558_v25, %v1582_v26  ;;  %v1665_v59 = vshrl.u32 %v1483_v51, 16 }
 0x2a4   :  { %v1649_v53 = vpack.i.b16 %v1648_v35, %v1647_v50  ;;  %v1615_v55 = vpack.i.b16 %v1614_v38, %v1613_v52  ;;  %v1924_v56 = vsel %vm1684_vm1, %v1664_v39, 0  ;;  %v1481_v61 = vcombine.high %v1440_v14, %v1464_v16 }
 0x2a5   :  { %v1667_v62 = vpack.i.b16 %v1666_v57, %v1665_v59  ;;  %v1654_v3 = vshrl.u32 %v1599_v58, 16  ;;  %v2065_v10 = vand.u32 127, %v166_v46  ;;  %v2063_v11 = vadd.s32 8, %v4730_v54 }
 0x2a6   :  { %v1652_v63 = vpack.i.b16 %v1599_v58, %v1481_v61  ;;  %v1653_v7 = vshrl.u32 %v1481_v61, 16 }
 0x2a7   :  { %v2018_v2 = vsel %vm1684_vm1, %v1667_v62, 0  ;;  %vm4923_vm2 = vcmp.ge.s32.totalorder %v4730_v54, %v2065_v10  ;;  %vm4927_vm4 = vcmp.ge.s32.totalorder %v2063_v11, %v2065_v10 }
 0x2a8   :  { %4036 = vmatmul.mubr.msk.bf16.vlgmr.msra.gmra.mrb[12].mxu0 %vm1684_vm1, %v1646_v42  ;;  %v1655_v8 = vpack.i.b16 %v1654_v3, %v1653_v7 }
 0x2a9   :  { %4054 = vmatmul.mubr.msk.bf16.vlgmr.msra.gmra.mrb[8].mxu1 %vm1684_vm1, %v1612_v47  ;;  %4046 = vmatpush3.bf16.xpose.msra.mxu0 %v1830_v48 }
 0x2aa   :  { %4064 = vmatpush3.bf16.xpose.msra.mxu1 %v1971_v41  ;;  %4065 = vmatprep.mubr.msk.bf16.mxu1 %vm4576_vm0, %v4575_v45 }
 0x2ab   :  { %4047 = vmatprep.mubr.msk.bf16.mxu0 %vm4576_vm0, %v4575_v45  ;;  %4057 = vmatprep.subr.bf16.mxu0 %v4575_v45 }
 0x2ac   :  { %4075 = vmatprep.subr.bf16.mxu1 %v4575_v45 }
 0x2b0   :  { %4048 = vmatmul.mubr.msk.bf16.vlgmr.msra.gmra.mrb[16].mxu0 %vm1684_vm1, %v1649_v53 }
 0x2b1   :  { %4066 = vmatmul.mubr.msk.bf16.vlgmr.msra.gmra.mrb[12].mxu1 %vm1684_vm1, %v1615_v55  ;;  %4058 = vmatpush3.bf16.xpose.msra.mxu0 %v1924_v56 }
 0x2b2   :  { %4059 = vmatprep.mubr.msk.bf16.mxu0 %vm4576_vm0, %v4575_v45  ;;  %4069 = vmatprep.subr.bf16.mxu0 %v4575_v45 }
 0x2b3   :  { %4077 = vmatprep.mubr.msk.bf16.mxu1 %vm4576_vm0, %v4575_v45 }
 0x2b8   :  { %4060 = vmatmul.mubr.msk.bf16.vlgmr.msra.gmra.mrb[20].mxu0 %vm1684_vm1, %v1652_v63 }
 0x2b9   :  { %4070 = vmatpush3.bf16.xpose.msra.mxu0 %v2018_v2  ;;  %4071 = vmatprep.mubr.msk.bf16.mxu0 %vm4576_vm0, %v4575_v45 }
 0x2ba   :  { %4081 = vmatprep.subr.bf16.mxu0 %v4575_v45 }
 0x2c0   :  { %4072 = vmatmul.mubr.msk.bf16.vlgmr.msra.gmra.mrb[24].mxu0 %vm1684_vm1, %v1655_v8 }
 0x2c1   :  { %4083 = vmatprep.mubr.msk.bf16.mxu0 %vm4576_vm0, %v4575_v45 }
 0x372   :  { %v1725_v12 = vpop.f32.mrb[8].mxu0 }
 0x373   :  { %v4933_v15 = vsel %vm4923_vm2, %v1725_v12, -1e+09  ;;  %v4031_v0 = vpop.f32.mrb[9].mxu0 }
 0x374   :  { %v1728_v17 = vpop.f32.mrb[10].mxu0  ;;  %v1819_v46 = vpop.f32.mrb[4].mxu1  ;;  %v2089_v19 = vsel %vm2088_vm3, %v4933_v15, -inf }
 0x375   :  { %v4939_v20 = vsel %vm4927_vm4, %v1728_v17, -1e+09  ;;  %v4943_v22 = vsel %vm4923_vm2, %v1819_v46, -1e+09  ;;  %v4043_v1 = vpop.f32.mrb[5].mxu1  ;;  %2090 = vmax.xlane.f32.xlu0 %v2089_v19  ;;  %v4032_v23 = vpop.f32.mrb[11].mxu0 }
 0x376   :  { %v1822_v25 = vpop.f32.mrb[6].mxu1  ;;  %v2092_v26 = vsel %vm2088_vm3, %v4939_v20, -inf  ;;  %v2101_v14 = vsel %vm2088_vm3, %v4943_v22, -inf }
 0x377   :  { %v4949_v27 = vsel %vm4927_vm4, %v1822_v25, -1e+09  ;;  %v4044_v5 = vpop.f32.mrb[7].mxu1  ;;  %2093 = vmax.xlane.f32.xlu1 %v2092_v26 }
 0x378   :  { %v2104_v16 = vsel %vm2088_vm3, %v4949_v27, -inf }
 0x379   :  { %2102 = vmax.xlane.f32.xlu0 %v2101_v14 }
 0x37b   :  { %2105 = vmax.xlane.f32.xlu1 %v2104_v16  ;;  %v1772_v28 = vpop.f32.mrb[12].mxu0 }
 0x37c   :  { %v1913_v29 = vpop.f32.mrb[8].mxu1  ;;  %v4957_v21 = vsel %vm4923_vm2, %v1772_v28, -1e+09  ;;  %v4037_v24 = vpop.f32.mrb[13].mxu0 }
 0x37d   :  { %v4055_v6 = vpop.f32.mrb[9].mxu1  ;;  %v1775_v33 = vpop.f32.mrb[14].mxu0  ;;  %v2095_v34 = vsel %vm2088_vm3, %v4957_v21, -inf  ;;  %v4975_v49 = vsel %vm4923_vm2, %v1913_v29, -1e+09 }
 0x37e   :  { %v1916_v31 = vpop.f32.mrb[10].mxu1  ;;  %v4963_v32 = vsel %vm4927_vm4, %v1775_v33, -1e+09  ;;  %2096 = vmax.xlane.f32.xlu0 %v2095_v34  ;;  %v4038_v37 = vpop.f32.mrb[15].mxu0  ;;  %v2113_v39 = vsel %vm2088_vm3, %v4975_v49, -inf }
 0x37f   :  { %v4967_v36 = vsel %vm4927_vm4, %v1916_v31, -1e+09  ;;  %v4056_v42 = vpop.f32.mrb[11].mxu1  ;;  %v2098_v48 = vsel %vm2088_vm3, %v4963_v32, -inf }
 0x380   :  { %v2116_v47 = vsel %vm2088_vm3, %v4967_v36, -inf }
 0x381   :  { %2117 = vmax.xlane.f32.xlu1 %v2116_v47 }
 0x382   :  { %2099 = vmax.xlane.f32.xlu0 %v2098_v48 }
 0x383   :  { %v1866_v41 = vpop.f32.mrb[16].mxu0 }
 0x384   :  { %v2007_v35 = vpop.f32.mrb[12].mxu1  ;;  %v4049_v51 = vpop.f32.mrb[17].mxu0  ;;  %v4981_v52 = vsel %vm4923_vm2, %v1866_v41, -1e+09 }
 0x385   :  { %v4067_v38 = vpop.f32.mrb[13].mxu1  ;;  %v1869_v50 = vpop.f32.mrb[18].mxu0  ;;  %v2107_v61 = vsel %vm2088_vm3, %v4981_v52, -inf  ;;  %v4997_v62 = vsel %vm4923_vm2, %v2007_v35, -1e+09 }
 0x386   :  { %v2010_v53 = vpop.f32.mrb[14].mxu1  ;;  %v4985_v55 = vsel %vm4927_vm4, %v1869_v50, -1e+09  ;;  %2114 = vmax.xlane.f32.xlu0 %v2113_v39  ;;  %v4050_v56 = vpop.f32.mrb[19].mxu0  ;;  %v2125_v8 = vsel %vm2088_vm3, %v4997_v62, -inf }
 0x387   :  { %v4068_v57 = vpop.f32.mrb[15].mxu1  ;;  %v2110_v58 = vsel %vm2088_vm3, %v4985_v55, -inf  ;;  %v4991_v59 = vsel %vm4927_vm4, %v2010_v53, -1e+09 }
 0x388   :  { %2111 = vmax.xlane.f32.xlu1 %v2110_v58  ;;  %v2128_v2 = vsel %vm2088_vm3, %v4991_v59, -inf }
 0x38a   :  { %2108 = vmax.xlane.f32.xlu0 %v2107_v61 }
 0x38b   :  { %v1960_v63 = vpop.f32.mrb[20].mxu0 }
 0x38c   :  { %2129 = vmax.xlane.f32.xlu1 %v2128_v2  ;;  %v4061_v3 = vpop.f32.mrb[21].mxu0  ;;  %v5005_v10 = vsel %vm4923_vm2, %v1960_v63, -1e+09 }
 0x38d   :  { %v1963_v7 = vpop.f32.mrb[22].mxu0  ;;  %v2119_v0 = vsel %vm2088_vm3, %v5005_v10, -inf }
 0x38e   :  { %v5009_v11 = vsel %vm4927_vm4, %v1963_v7, -1e+09  ;;  %2126 = vmax.xlane.f32.xlu0 %v2125_v8  ;;  %v4062_v12 = vpop.f32.mrb[23].mxu0 }
 0x38f   :  { %v2122_v43 = vsel %vm2088_vm3, %v5009_v11, -inf }
 0x392   :  { %2120 = vmax.xlane.f32.xlu0 %v2119_v0 }
 0x393   :  { %v2054_v17 = vpop.f32.mrb[24].mxu0 }
 0x394   :  { %v5015_v46 = vsel %vm4923_vm2, %v2054_v17, -1e+09  ;;  %v4073_v19 = vpop.f32.mrb[25].mxu0  ;;  %v5073_v17 = vpack.i.b16 %v4572_v30, %v4572_v30 }
 0x395   :  { %v2057_v1 = vpop.f32.mrb[26].mxu0  ;;  %v2131_v26 = vsel %vm2088_vm3, %v5015_v46, -inf }
 0x396   :  { %v5019_v23 = vsel %vm4927_vm4, %v2057_v1, -1e+09  ;;  %v4074_v25 = vpop.f32.mrb[27].mxu0 }
 0x397   :  { %v2134_v13 = vsel %vm2088_vm3, %v5019_v23, -inf }
 0x39d   :  { %486 = vrot.lane.b32.xlu1 %v4758_v44, %s4560_s1 }
 0x3a1   :  { %490 = vrot.lane.b32.xlu1 %v4758_v44, %s4574_s23 }
 0x3a8   :  { %482 = vrot.lane.b32.xlu0 %v4758_v44, %s4573_s6 }
 0x3c5   :  { %2123 = vmax.xlane.f32.xlu1 %v2122_v43 }
 0x3c7   :  { %2132 = vmax.xlane.f32.xlu0 %v2131_v26 }
 0x3c9   :  { %2135 = vmax.xlane.f32.xlu1 %v2134_v13 }
 0x3da   :  { %484 = vrot.lane.b32.xlu1 %v4754_v40, %s4573_s6 }
 0x3dd   :  { %488 = vrot.lane.b32.xlu0 %v4754_v40, %s4560_s1 }
 0x402   :  { %v2091_v5 = vpop.xlane.xlu0 %2090 }
 0x403   :  { %v2137_v14 = vsub.f32 %v4933_v15, %v2091_v5 }
 0x404   :  { %v2094_v16 = vpop.xlane.xlu1 %2093 }
 0x405   :  { %v2153_v28 = vmul.f32 1.442695, %v2137_v14  ;;  %v2138_v29 = vsub.f32 %v4939_v20, %v2094_v16 }
 0x406   :  { %v2103_v6 = vpop.xlane.xlu0 %2102 }
 0x407   :  { %4317 = vpow2.f32 %v2153_v28  ;;  %v2155_v24 = vmul.f32 1.442695, %v2138_v29  ;;  %v2141_v33 = vsub.f32 %v4943_v22, %v2103_v6  ;;  %v530_v6 = vshrl.u32 %v4758_v44, 16 }
 0x408   :  { %v5041_v37 = vpop.xlane.xlu1 %2105 }
 0x409   :  { %4319 = vpow2.f32 %v2155_v24  ;;  %v2161_v42 = vmul.f32 1.442695, %v2141_v33 }
 0x40b   :  { %v2097_v34 = vpop.xlane.xlu0 %2096 }
 0x40c   :  { %v2139_v31 = vsub.f32 %v4957_v21, %v2097_v34 }
 0x40e   :  { %v2157_v47 = vmul.f32 1.442695, %v2139_v31  ;;  %v5046_v20 = vpop.xlane.xlu1 %2117 }
 0x40f   :  { %v2100_v48 = vpop.xlane.xlu0 %2099 }
 0x410   :  { %4321 = vpow2.f32 %v2157_v47  ;;  %v2140_v15 = vsub.f32 %v4963_v32, %v2100_v48 }
 0x411   :  { %v5044_v41 = vpop.eup %4317  ;;  %4323 = vpow2.f32 %v2161_v42 }
 0x412   :  { %v2159_v35 = vmul.f32 1.442695, %v2140_v15  ;;  %v2185_v22 = vsel %vm2088_vm3, %v5044_v41, 0.0 }
 0x413   :  { %v5050_v51 = vpop.eup %4319  ;;  %2186 = vadd.xlane.f32.xlu0 %v2185_v22  ;;  %v2115_v21 = vpop.xlane.xlu0 %2114 }
 0x414   :  { %4325 = vpow2.f32 %v2159_v35  ;;  %v2188_v38 = vsel %vm2088_vm3, %v5050_v51, 0.0  ;;  %v2145_v50 = vsub.f32 %v4975_v49, %v2115_v21 }
 0x415   :  { %2189 = vadd.xlane.f32.xlu1 %v2188_v38  ;;  %v2112_v32 = vpop.xlane.xlu1 %2111 }
 0x416   :  { %v2144_v39 = vsub.f32 %v4985_v55, %v2112_v32  ;;  %v2169_v53 = vmul.f32 1.442695, %v2145_v50 }
 0x417   :  { %v2109_v56 = vpop.xlane.xlu0 %2108 }
 0x418   :  { %v2143_v57 = vsub.f32 %v4981_v52, %v2109_v56  ;;  %v2167_v58 = vmul.f32 1.442695, %v2144_v39  ;;  %4327 = vpow2.f32 %v2169_v53 }
 0x419   :  { %v5057_v61 = vpop.xlane.xlu1 %2129 }
 0x41a   :  { %v5059_v63 = vpop.eup %4321  ;;  %v2165_v2 = vmul.f32 1.442695, %v2143_v57 }
 0x41b   :  { %v2127_v3 = vpop.xlane.xlu0 %2126  ;;  %v2191_v7 = vsel %vm2088_vm3, %v5059_v63, 0.0  ;;  %v5063_v49 = vpop.eup %4323 }
 0x41c   :  { %4329 = vpow2.f32 %v2165_v2  ;;  %2192 = vadd.xlane.f32.xlu0 %v2191_v7  ;;  %v2197_v12 = vsel %vm2088_vm3, %v5063_v49, 0.0  ;;  %v2149_v19 = vsub.f32 %v4997_v62, %v2127_v3 }
 0x41d   :  { %4331 = vpow2.f32 %v2167_v58  ;;  %v487_v55 = vpop.permute.xlu1 %486 }
 0x41e   :  { %v5065_v8 = vpop.eup %4325  ;;  %v538_v43 = vshrl.u32 %v487_v55, 16  ;;  %v2177_v16 = vmul.f32 1.442695, %v2149_v19 }
 0x41f   :  { %v2121_v52 = vpop.xlane.xlu0 %2120  ;;  %v2194_v0 = vsel %vm2088_vm3, %v5065_v8, 0.0 }
 0x420   :  { %v2147_v1 = vsub.f32 %v5005_v10, %v2121_v52  ;;  %2198 = vadd.xlane.f32.xlu0 %v2197_v12  ;;  %2195 = vadd.xlane.f32.xlu1 %v2194_v0 }
 0x421   :  { %v491_v25 = vpop.permute.xlu1 %490 }
 0x422   :  { %v2173_v26 = vmul.f32 1.442695, %v2147_v1  ;;  %v536_v13 = vpack.i.b16 %v491_v25, %v487_v55  ;;  %v539_v5 = vshrl.u32 %v491_v25, 16  ;;  %v5078_v24 = vpop.eup %4327 }
 0x423   :  { %v483_v14 = vpop.permute.xlu0 %482  ;;  %v2209_v56 = vsel %vm2088_vm3, %v5078_v24, 0.0 }
 0x424   :  { %v540_v28 = vpack.i.b16 %v539_v5, %v538_v43  ;;  %v643_v29 = vcombine.high %v536_v13, %v5073_v17  ;;  %v528_v62 = vpack.i.b16 %v483_v14, %v4758_v44  ;;  %v531_v33 = vshrl.u32 %v483_v14, 16 }
 0x425   :  { %4333 = vpow2.f32 %v2173_v26  ;;  %v650_v34 = vrot.slane %v536_v13, %v4782_v4 }
 0x426   :  { %v5082_v10 = vpop.eup %4329  ;;  %v532_v42 = vpack.i.b16 %v531_v33, %v530_v6  ;;  %v628_v47 = vcombine.high %v528_v62, %v5073_v17  ;;  %v635_v48 = vrot.slane %v528_v62, %v4782_v4  ;;  %4335 = vpow2.f32 %v2177_v16 }
 0x427   :  { %v5085_v31 = vpop.eup %4331  ;;  %v2203_v15 = vsel %vm2088_vm3, %v5082_v10, 0.0  ;;  %v657_v35 = vrot.slane %v643_v29, %v4782_v4  ;;  %v777_v44 = vcombine.high %v540_v28, %v5073_v17  ;;  %v784_v32 = vrot.slane %v540_v28, %v4782_v4 }
 0x428   :  { %2204 = vadd.xlane.f32.xlu0 %v2203_v15  ;;  %v642_v22 = vrot.slane %v628_v47, %v4782_v4  ;;  %v690_v21 = vcombine.low %v635_v48, %v650_v34  ;;  %v691_v38 = vcombine.high %v635_v48, %v650_v34  ;;  %v762_v50 = vcombine.high %v532_v42, %v5073_v17 }
 0x429   :  { %v769_v39 = vrot.slane %v532_v42, %v4782_v4  ;;  %v2206_v53 = vsel %vm2088_vm3, %v5085_v31, 0.0  ;;  %v791_v7 = vrot.slane %v777_v44, %v4782_v4 }
 0x42a   :  { %v698_v57 = vrot.slane %v690_v21, %v4786_v18  ;;  %v705_v58 = vrot.slane %v691_v38, %v4786_v18  ;;  %v706_v2 = vcombine.low %v642_v22, %v657_v35  ;;  %v707_v3 = vcombine.high %v642_v22, %v657_v35 }
 0x42b   :  { %v776_v55 = vrot.slane %v762_v50, %v4782_v4  ;;  %v824_v52 = vcombine.low %v769_v39, %v784_v32  ;;  %v825_v12 = vcombine.high %v769_v39, %v784_v32 }
 0x42c   :  { %2207 = vadd.xlane.f32.xlu0 %v2206_v53  ;;  %v714_v0 = vrot.slane %v706_v2, %v4786_v18  ;;  %v721_v19 = vrot.slane %v707_v3, %v4786_v18  ;;  %v3766_v1 = vcombine.low %v698_v57, %v705_v58  ;;  %v3768_v25 = vcombine.high %v698_v57, %v705_v58 }
 0x42d   :  { %v832_v43 = vrot.slane %v824_v52, %v4786_v18  ;;  %v839_v26 = vrot.slane %v825_v12, %v4786_v18  ;;  %v840_v13 = vcombine.low %v776_v55, %v791_v7  ;;  %v841_v5 = vcombine.high %v776_v55, %v791_v7 }
 0x42e   :  { %v1147_v14 = vrot.slane %v3766_v1, %v4782_v4  ;;  %v1163_v16 = vrot.slane %v3768_v25, %v4782_v4  ;;  %v3770_v28 = vcombine.low %v714_v0, %v721_v19  ;;  %v3772_v29 = vcombine.high %v714_v0, %v721_v19 }
 0x42f   :  { %v5111_v6 = vpop.eup %4333  ;;  %v848_v62 = vrot.slane %v840_v13, %v4786_v18  ;;  %v855_v33 = vrot.slane %v841_v5, %v4786_v18  ;;  %v3774_v34 = vcombine.low %v832_v43, %v839_v26  ;;  %v3776_v42 = vcombine.high %v832_v43, %v839_v26 }
 0x430   :  { %2210 = vadd.xlane.f32.xlu0 %v2209_v56  ;;  %v1179_v47 = vrot.slane %v3770_v28, %v4782_v4  ;;  %v1195_v48 = vrot.slane %v3772_v29, %v4782_v4  ;;  %v1212_v15 = vcombine.low %v1147_v14, %v1163_v16  ;;  %v5119_v35 = vpop.eup %4335  ;;  %v2215_v50 = vsel %vm2088_vm3, %v5111_v6, 0.0 }
 0x431   :  { %492 = vrot.lane.b32.xlu1 %v4754_v40, %s4574_s23  ;;  %v1265_v44 = vrot.slane %v3774_v34, %v4782_v4  ;;  %v1281_v22 = vrot.slane %v3776_v42, %v4782_v4  ;;  %v3778_v21 = vcombine.low %v848_v62, %v855_v33  ;;  %v3780_v38 = vcombine.high %v848_v62, %v855_v33 }
 0x432   :  { %v1236_v32 = vcombine.low %v1179_v47, %v1195_v48  ;;  %v1219_v57 = vrot.slane %v1212_v15, %v4786_v18  ;;  %v2221_v3 = vsel %vm2088_vm3, %v5119_v35, 0.0  ;;  %v2142_v28 = vsub.f32 %v4949_v27, %v5041_v37 }
 0x433   :  { %v1297_v39 = vrot.slane %v3778_v21, %v4782_v4  ;;  %v1313_v53 = vrot.slane %v3780_v38, %v4782_v4  ;;  %v1330_v56 = vcombine.low %v1265_v44, %v1281_v22  ;;  %v2146_v62 = vsub.f32 %v4967_v36, %v5046_v20 }
 0x434   :  { %2216 = vadd.xlane.f32.xlu0 %v2215_v50  ;;  %v1243_v58 = vrot.slane %v1236_v32, %v4786_v18  ;;  %v2163_v29 = vmul.f32 1.442695, %v2142_v28  ;;  %v2150_v34 = vsub.f32 %v4991_v59, %v5057_v61 }
 0x435   :  { %v1354_v2 = vcombine.low %v1297_v39, %v1313_v53  ;;  %v1337_v52 = vrot.slane %v1330_v56, %v4786_v18  ;;  %v2171_v33 = vmul.f32 1.442695, %v2146_v62 }
 0x436   :  { %v1248_v7 = vcombine.low %v1219_v57, %v1243_v58  ;;  %v5131_v55 = vcombine.high %v1219_v57, %v1243_v58  ;;  %4337 = vpow2.f32 %v2163_v29  ;;  %v2179_v15 = vmul.f32 1.442695, %v2150_v34 }
 0x437   :  { %v1361_v12 = vrot.slane %v1354_v2, %v4786_v18  ;;  %4339 = vpow2.f32 %v2171_v33 }
 0x438   :  { %2222 = vadd.xlane.f32.xlu0 %v2221_v3  ;;  %v1632_v1 = vshrl.u32 %v1248_v7, 16  ;;  %v1640_v25 = vshrl.u32 %v5131_v55, 16 }
 0x439   :  { %v1366_v0 = vcombine.low %v1337_v52, %v1361_v12  ;;  %v5135_v19 = vcombine.high %v1337_v52, %v1361_v12 }
 0x43b   :  { %v1630_v43 = vpack.i.b16 %v1366_v0, %v1248_v7  ;;  %v1633_v26 = vshrl.u32 %v1366_v0, 16  ;;  %v1638_v13 = vpack.i.b16 %v5135_v19, %v5131_v55  ;;  %v1641_v5 = vshrl.u32 %v5135_v19, 16 }
 0x43c   :  { %v584_v0 = vshrl.u32 %v4754_v40, 16 }
 0x43d   :  { %4076 = vmatpush3.bf16.msra.mxu1 %v1630_v43  ;;  %v5141_v14 = vpack.i.b16 %v1633_v26, %v1632_v1  ;;  %v5143_v16 = vpack.i.b16 %v1641_v5, %v1640_v25 }
 0x43e   :  { %4087 = vmatprep.subr.bf16.mxu1 %v4575_v45 }
 0x440   :  { %v5152_v42 = vpop.eup %4337 }
 0x441   :  { %v2200_v27 = vsel %vm2088_vm3, %v5152_v42, 0.0  ;;  %v5157_v37 = vpop.eup %4339 }
 0x452   :  { %v2124_v47 = vpop.xlane.xlu1 %2123 }
 0x453   :  { %v2148_v48 = vsub.f32 %v5009_v11, %v2124_v47  ;;  %v2212_v11 = vsel %vm2088_vm3, %v5157_v37, 0.0 }
 0x454   :  { %v2133_v44 = vpop.xlane.xlu0 %2132 }
 0x455   :  { %v2175_v22 = vmul.f32 1.442695, %v2148_v48  ;;  %v2151_v36 = vsub.f32 %v5015_v46, %v2133_v44  ;;  %2201 = vadd.xlane.f32.xlu1 %v2200_v27 }
 0x456   :  { %v2136_v20 = vpop.xlane.xlu1 %2135 }
 0x457   :  { %4341 = vpow2.f32 %v2175_v22  ;;  %v2181_v21 = vmul.f32 1.442695, %v2151_v36  ;;  %v2152_v59 = vsub.f32 %v5019_v23, %v2136_v20 }
 0x458   :  { %4343 = vpow2.f32 %v2179_v15  ;;  %v489_v57 = vpop.permute.xlu0 %488 }
 0x459   :  { %4345 = vpow2.f32 %v2181_v21  ;;  %v2183_v61 = vmul.f32 1.442695, %v2152_v59  ;;  %2213 = vadd.xlane.f32.xlu1 %v2212_v11  ;;  %v592_v34 = vshrl.u32 %v489_v57, 16 }
 0x45a   :  { %v485_v58 = vpop.permute.xlu1 %484 }
 0x45b   :  { %4347 = vpow2.f32 %v2183_v61  ;;  %v585_v52 = vshrl.u32 %v485_v58, 16  ;;  %v582_v1 = vpack.i.b16 %v485_v58, %v4754_v40 }
 0x45d   :  { %v586_v5 = vpack.i.b16 %v585_v52, %v584_v0  ;;  %v896_v62 = vcombine.high %v582_v1, %v5073_v17  ;;  %v903_v40 = vrot.slane %v582_v1, %v4782_v4 }
 0x45f   :  { %v1030_v15 = vcombine.high %v586_v5, %v5073_v17  ;;  %v910_v27 = vrot.slane %v896_v62, %v4782_v4  ;;  %v1037_v59 = vrot.slane %v586_v5, %v4782_v4 }
 0x461   :  { %v5163_v38 = vpop.eup %4341  ;;  %v1044_v11 = vrot.slane %v1030_v15, %v4782_v4 }
 0x462   :  { %v5165_v50 = vpop.eup %4343  ;;  %v2218_v46 = vsel %vm2088_vm3, %v5163_v38, 0.0 }
 0x463   :  { %v5169_v32 = vpop.eup %4345  ;;  %2219 = vadd.xlane.f32.xlu1 %v2218_v46  ;;  %v2224_v39 = vsel %vm2088_vm3, %v5165_v50, 0.0 }
 0x464   :  { %v2227_v23 = vsel %vm2088_vm3, %v5169_v32, 0.0 }
 0x465   :  { %2228 = vadd.xlane.f32.xlu0 %v2227_v23  ;;  %v5175_v53 = vpop.eup %4347 }
 0x466   :  { %v2230_v56 = vsel %vm2088_vm3, %v5175_v53, 0.0 }
 0x467   :  { %2225 = vadd.xlane.f32.xlu1 %v2224_v39 }
 0x46b   :  { %2231 = vadd.xlane.f32.xlu1 %v2230_v56 }
 0x4a0   :  { %v2187_v2 = vpop.xlane.xlu0 %2186 }
 0x4a1   :  { %4349 = vrcp.f32 %v2187_v2 }
 0x4a2   :  { %v2190_v3 = vpop.xlane.xlu1 %2189 }
 0x4a3   :  { %4351 = vrcp.f32 %v2190_v3 }
 0x4a9   :  { %v2193_v28 = vpop.xlane.xlu0 %2192 }
 0x4aa   :  { %4353 = vrcp.f32 %v2193_v28 }
 0x4ab   :  { %v4350_v7 = vpop.eup %4349 }
 0x4ac   :  { %v2249_v43 = vmul.f32 %v4350_v7, %v5044_v41 }
 0x4ad   :  { %v4352_v12 = vpop.eup %4351  ;;  %v2196_v25 = vpop.xlane.xlu1 %2195 }
 0x4ae   :  { %v2250_v26 = vmul.f32 %v4352_v12, %v5050_v51  ;;  %v5194_v22 = vpop.xlane.xlu0 %2198  ;;  %4355 = vrcp.f32 %v2196_v25 }
 0x4b0   :  { %v2265_v29 = vpack.c.bf16 %v2250_v26, %v2249_v43 }
 0x4b1   :  { %v493_v33 = vpop.permute.xlu1 %492 }
 0x4b2   :  { %4078 = vmatmul.mubr.msk.bf16.vlgmr.msra.gmra.mrb[16].mxu1 %vm2088_vm3, %v2265_v29  ;;  %v590_v47 = vpack.i.b16 %v493_v33, %v489_v57  ;;  %v593_v48 = vshrl.u32 %v493_v33, 16 }
 0x4b3   :  { %4088 = vmatpush3.bf16.msra.mxu1 %v5141_v14  ;;  %4089 = vmatprep.mubr.msk.bf16.mxu1 %vm4576_vm0, %v4575_v45 }
 0x4b4   :  { %v594_v41 = vpack.i.b16 %v593_v48, %v592_v34  ;;  %v911_v51 = vcombine.high %v590_v47, %v5073_v17  ;;  %v918_v44 = vrot.slane %v590_v47, %v4782_v4  ;;  %4099 = vmatprep.subr.bf16.mxu1 %v4575_v45 }
 0x4b5   :  { %v2205_v52 = vpop.xlane.xlu0 %2204 }
 0x4b6   :  { %v925_v36 = vrot.slane %v911_v51, %v4782_v4  ;;  %v958_v20 = vcombine.low %v903_v40, %v918_v44  ;;  %v959_v14 = vcombine.high %v903_v40, %v918_v44  ;;  %v1045_v21 = vcombine.high %v594_v41, %v5073_v17 }
 0x4b7   :  { %v1052_v61 = vrot.slane %v594_v41, %v4782_v4 }
 0x4b8   :  { %v966_v46 = vrot.slane %v958_v20, %v4786_v18  ;;  %v973_v23 = vrot.slane %v959_v14, %v4786_v18  ;;  %v974_v39 = vcombine.low %v910_v27, %v925_v36  ;;  %v975_v56 = vcombine.high %v910_v27, %v925_v36 }
 0x4b9   :  { %v1059_v57 = vrot.slane %v1045_v21, %v4782_v4  ;;  %v1092_v58 = vcombine.low %v1037_v59, %v1052_v61  ;;  %v1093_v2 = vcombine.high %v1037_v59, %v1052_v61  ;;  %v2208_v27 = vpop.xlane.xlu0 %2207 }
 0x4ba   :  { %v982_v17 = vrot.slane %v974_v39, %v4786_v18  ;;  %v989_v3 = vrot.slane %v975_v56, %v4786_v18  ;;  %v3782_v7 = vcombine.low %v966_v46, %v973_v23  ;;  %v3784_v5 = vcombine.high %v966_v46, %v973_v23 }
 0x4bb   :  { %v1100_v12 = vrot.slane %v1092_v58, %v4786_v18  ;;  %v1107_v0 = vrot.slane %v1093_v2, %v4786_v18  ;;  %v1108_v1 = vcombine.low %v1044_v11, %v1059_v57  ;;  %v1109_v43 = vcombine.high %v1044_v11, %v1059_v57  ;;  %v4354_v11 = vpop.eup %4353 }
 0x4bc   :  { %v1383_v26 = vrot.slane %v3782_v7, %v4782_v4  ;;  %v3786_v28 = vcombine.low %v982_v17, %v989_v3  ;;  %v3788_v29 = vcombine.high %v982_v17, %v989_v3  ;;  %v1399_v47 = vrot.slane %v3784_v5, %v4782_v4  ;;  %v4356_v23 = vpop.eup %4355 }
 0x4bd   :  { %v1116_v62 = vrot.slane %v1108_v1, %v4786_v18  ;;  %v1123_v25 = vrot.slane %v1109_v43, %v4786_v18  ;;  %v3790_v33 = vcombine.low %v1100_v12, %v1107_v0  ;;  %v3792_v34 = vcombine.high %v1100_v12, %v1107_v0 }
 0x4be   :  { %v1415_v48 = vrot.slane %v3786_v28, %v4782_v4  ;;  %v1431_v15 = vrot.slane %v3788_v29, %v4782_v4  ;;  %v1448_v20 = vcombine.low %v1383_v26, %v1399_v47  ;;  %4357 = vrcp.f32 %v2208_v27 }
 0x4bf   :  { %v1501_v40 = vrot.slane %v3790_v33, %v4782_v4  ;;  %v1517_v41 = vrot.slane %v3792_v34, %v4782_v4  ;;  %v3794_v51 = vcombine.low %v1116_v62, %v1123_v25  ;;  %v3796_v44 = vcombine.high %v1116_v62, %v1123_v25 }
 0x4c0   :  { %v1472_v36 = vcombine.low %v1415_v48, %v1431_v15  ;;  %4359 = vrcp.f32 %v2205_v52  ;;  %v1455_v39 = vrot.slane %v1448_v20, %v4786_v18  ;;  %v2252_v17 = vmul.f32 %v4356_v23, %v5065_v8 }
 0x4c1   :  { %v1533_v14 = vrot.slane %v3794_v51, %v4782_v4  ;;  %v1549_v21 = vrot.slane %v3796_v44, %v4782_v4  ;;  %v1566_v59 = vcombine.low %v1501_v40, %v1517_v41  ;;  %v2251_v7 = vmul.f32 %v4354_v11, %v5059_v63 }
 0x4c2   :  { %v1479_v61 = vrot.slane %v1472_v36, %v4786_v18  ;;  %4361 = vrcp.f32 %v5194_v22 }
 0x4c3   :  { %v1590_v46 = vcombine.low %v1533_v14, %v1549_v21  ;;  %v1573_v56 = vrot.slane %v1566_v59, %v4786_v18  ;;  %v2266_v0 = vpack.c.bf16 %v2252_v17, %v2251_v7 }
 0x4c4   :  { %v1484_v58 = vcombine.low %v1455_v39, %v1479_v61  ;;  %v1485_v26 = vcombine.high %v1455_v39, %v1479_v61 }
 0x4c5   :  { %v1597_v57 = vrot.slane %v1590_v46, %v4786_v18 }
 0x4c6   :  { %v1672_v12 = vshrl.u32 %v1484_v58, 16 }
 0x4c7   :  { %v1602_v2 = vcombine.low %v1573_v56, %v1597_v57  ;;  %v1603_v8 = vcombine.high %v1573_v56, %v1597_v57 }
 0x4c8   :  { %v4358_v52 = vpop.eup %4357 }
 0x4c9   :  { %v1670_v3 = vpack.i.b16 %v1602_v2, %v1484_v58  ;;  %v1673_v4 = vshrl.u32 %v1602_v2, 16  ;;  %v2256_v18 = vmul.f32 %v4358_v52, %v5085_v31  ;;  %v1678_v28 = vpack.i.b16 %v1603_v8, %v1485_v26  ;;  %v2211_v31 = vpop.xlane.xlu0 %2210  ;;  %v4225_v52 = vld [vmem:[#allocation8 + $0x20] sm:$0xff]  }
 0x4ca   :  { %v4360_v43 = vpop.eup %4359  ;;  %v1681_v19 = vshrl.u32 %v1603_v8, 16 }
 0x4cb   :  { %4082 = vmatpush3.bf16.msra.mxu0 %v1670_v3  ;;  %v1674_v1 = vpack.i.b16 %v1673_v4, %v1672_v12  ;;  %v2255_v63 = vmul.f32 %v4360_v43, %v5082_v10 }
 0x4cc   :  { %4093 = vmatprep.subr.bf16.mxu0 %v4575_v45  ;;  %v4362_v25 = vpop.eup %4361 }
 0x4cd   :  { %v2268_v5 = vpack.c.bf16 %v2256_v18, %v2255_v63  ;;  %v2217_v10 = vpop.xlane.xlu0 %2216  ;;  %v2253_v34 = vmul.f32 %v4362_v25, %v5063_v49  ;;  %v4227_v25 = vld [vmem:[#allocation8 + $0x30] sm:$0xff]  }
 0x4ce   :  { %4084 = vmatmul.mubr.msk.bf16.vlgmr.msra.gmra.mrb[28].mxu0 %vm2088_vm3, %v2266_v0  ;;  %v4224_v0 = vld [vmem:[#allocation8 + $0x18] sm:$0xff]  }
 0x4cf   :  { %4094 = vmatpush3.bf16.msra.mxu0 %v1674_v1  ;;  %4095 = vmatprep.mubr.msk.bf16.mxu0 %vm4576_vm0, %v4575_v45 }
 0x4d0   :  { %4105 = vmatprep.subr.bf16.mxu0 %v4575_v45 }
 0x4d1   :  { %v2223_v48 = vpop.xlane.xlu0 %2222 }
 0x4d6   :  { %4096 = vmatmul.mubr.msk.bf16.vlgmr.msra.gmra.mrb[32].mxu0 %vm2088_vm3, %v2268_v5 }
 0x4d7   :  { %4106 = vmatpush3.bf16.msra.mxu0 %v1678_v28  ;;  %4107 = vmatprep.mubr.msk.bf16.mxu0 %vm4576_vm0, %v4575_v45 }
 0x4d8   :  { %4117 = vmatprep.subr.bf16.mxu0 %v4575_v45 }
 0x4e2   :  { %v2202_v29 = vpop.xlane.xlu1 %2201 }
 0x4e3   :  { %4363 = vrcp.f32 %v2202_v29 }
 0x4e6   :  { %v2214_v62 = vpop.xlane.xlu1 %2213 }
 0x4e7   :  { %4365 = vrcp.f32 %v2214_v62  ;;  %v4226_v62 = vld [vmem:[#allocation8 + $0x28] sm:$0xff]  }
 0x4e8   :  { %4367 = vrcp.f32 %v2211_v31 }
 0x4e9   :  { %4369 = vrcp.f32 %v2217_v10 }
 0x4ed   :  { %v4364_v33 = vpop.eup %4363 }
 0x4ee   :  { %v2254_v47 = vmul.f32 %v4364_v33, %v5152_v42 }
 0x4f0   :  { %v2220_v15 = vpop.xlane.xlu1 %2219  ;;  %v2267_v40 = vpack.c.bf16 %v2254_v47, %v2253_v34 }
 0x4f1   :  { %v4366_v41 = vpop.eup %4365  ;;  %4371 = vrcp.f32 %v2220_v15 }
 0x4f2   :  { %4090 = vmatmul.mubr.msk.bf16.vlgmr.msra.gmra.mrb[20].mxu1 %vm2088_vm3, %v2267_v40  ;;  %v4368_v22 = vpop.eup %4367  ;;  %4373 = vrcp.f32 %v2223_v48  ;;  %v2258_v49 = vmul.f32 %v4366_v41, %v5157_v37  ;;  %v2229_v42 = vpop.xlane.xlu0 %2228 }
 0x4f3   :  { %4100 = vmatpush3.bf16.msra.mxu1 %v1638_v13  ;;  %4101 = vmatprep.mubr.msk.bf16.mxu1 %vm4576_vm0, %v4575_v45  ;;  %v2257_v44 = vmul.f32 %v4368_v22, %v5078_v24  ;;  %v4370_v20 = vpop.eup %4369  ;;  %v1680_v24 = vshrl.u32 %v1485_v26, 16 }
 0x4f4   :  { %v2226_v51 = vpop.xlane.xlu1 %2225  ;;  %4111 = vmatprep.subr.bf16.mxu1 %v4575_v45  ;;  %v2259_v13 = vmul.f32 %v4370_v20, %v5111_v6 }
 0x4f5   :  { %4375 = vrcp.f32 %v2226_v51  ;;  %v2269_v36 = vpack.c.bf16 %v2258_v49, %v2257_v44  ;;  %v1682_v11 = vpack.i.b16 %v1681_v19, %v1680_v24  ;;  %v4229_v24 = vld [vmem:[#allocation10] ss:$16 sps:$4 sm:$0xff]  }
 0x4f6   :  { %4377 = vrcp.f32 %v2229_v42  ;;  %v4228_v42 = vld [vmem:[#allocation8 + $0x38] sm:$0xff]  }
 0x4f8   :  { %v2232_v27 = vpop.xlane.xlu1 %2231 }
 0x4f9   :  { %4379 = vrcp.f32 %v2232_v27 }
 0x4fa   :  { %4102 = vmatmul.mubr.msk.bf16.vlgmr.msra.gmra.mrb[24].mxu1 %vm2088_vm3, %v2269_v36 }
 0x4fb   :  { %v4372_v55 = vpop.eup %4371  ;;  %4112 = vmatpush3.bf16.msra.mxu1 %v5143_v16  ;;  %4113 = vmatprep.mubr.msk.bf16.mxu1 %vm4576_vm0, %v4575_v45 }
 0x4fc   :  { %v2260_v37 = vmul.f32 %v4372_v55, %v5163_v38  ;;  %v4374_v14 = vpop.eup %4373 }
 0x4fd   :  { %v2261_v61 = vmul.f32 %v4374_v14, %v5119_v35  ;;  %v4221_v35 = vld [vmem:[#allocation8] sm:$0xff]  }
 0x4fe   :  { %v2270_v21 = vpack.c.bf16 %v2260_v37, %v2259_v13  ;;  %4123 = vmatprep.subr.bf16.mxu1 %v4221_v35 }
 0x4ff   :  { %v4376_v59 = vpop.eup %4375 }
 0x500   :  { %v2262_v46 = vmul.f32 %v4376_v59, %v5165_v50  ;;  %4108 = vmatmul.mubr.msk.bf16.vlgmr.msra.gmra.mrb[36].mxu0 %vm2088_vm3, %v2270_v21  ;;  %v4378_v16 = vpop.eup %4377  ;;  %v4222_v50 = vld [vmem:[#allocation8 + $0x8] sm:$0xff]   ;;  %v4231_v21 = vld [vmem:[#allocation10 + $0x4] ss:$16 sps:$4 sm:$0xff]  }
 0x501   :  { %4118 = vmatpush3.bf16.msra.mxu0 %v1682_v11  ;;  %4119 = vmatprep.mubr.msk.bf16.mxu0 %vm4576_vm0, %v4575_v45  ;;  %v2263_v38 = vmul.f32 %v4378_v16, %v5169_v32  ;;  %v4223_v45 = vld [vmem:[#allocation8 + $0x10] sm:$0xff]   ;;  %v4232_v59 = vld [vmem:[#allocation10 + $0x8] ss:$16 sps:$4 sm:$0xff]   ;;  %v4234_v11 = vld [vmem:[#allocation10 + $0xc] ss:$16 sps:$4 sm:$0xff]  }
 0x502   :  { %v2271_v23 = vpack.c.bf16 %v2262_v46, %v2261_v61  ;;  %3225 = vmatprep.subr.bf16.mxu0 %v4231_v21  ;;  %v2931_v61 = vsub.s32 4, %v4730_v54  ;;  %v5273_v46 = vld [vmem:[#allocation5] sm:$0x3f] }
 0x503   :  { %v4380_v6 = vpop.eup %4379 }
 0x504   :  { %v2264_v39 = vmul.f32 %v4380_v6, %v5175_v53  ;;  %4114 = vmatmul.mubr.msk.bf16.vlgmr.msra.gmra.mrb[28].mxu1 %vm2088_vm3, %v2271_v23  ;;  %v2932_v16 = vrot.slane %v5273_v46, %v2931_v61 }
 0x505   :  { %4124 = vmatpush3.bf16.msra.mxu1 %v4221_v35  ;;  %v4390_v35 = vld [vmem:[#allocation2] sm:$0xff] }
 0x506   :  { %v2272_v56 = vpack.c.bf16 %v2264_v39, %v2263_v38  ;;  %4125 = vmatprep.subr.bf16.mxu1 %v4222_v50 }
 0x508   :  { %4120 = vmatmul.mubr.msk.bf16.vlgmr.msra.gmra.mrb[40].mxu0 %vm2088_vm3, %v2272_v56 }
 0x509   :  { %3257 = vmatprep.mubr.bf16.mxu0 %v4572_v30  ;;  %4126 = vmatpush3.bf16.msra.mxu1 %v4222_v50 }
 0x50a   :  { %4131 = vmatprep.subr.bf16.mxu1 %v4223_v45  ;;  %3226 = vmatpush1.bf16.msra.mxu0 %v4229_v24 }
 0x585   :  { %v2310_v57 = vpop.f32.mrb[16].mxu1 }
 0x586   :  { %v4079_v58 = vpop.f32.mrb[17].mxu1 }
 0x587   :  { %v2313_v32 = vpop.f32.mrb[18].mxu1 }
 0x588   :  { %v2625_v2 = vpack.c.bf16 %v2313_v32, %v2310_v57  ;;  %v4080_v53 = vpop.f32.mrb[19].mxu1  ;;  %v4391_v57 = vld [vmem:[#allocation2 + $0x8] sm:$0xff] }
 0x58a   :  { %4127 = vmatprep.mubr.msk.bf16.mxu1 %vm1684_vm1, %v2625_v2 }
 0x5a1   :  { %v2354_v17 = vpop.f32.mrb[28].mxu0 }
 0x5a2   :  { %v4085_v3 = vpop.f32.mrb[29].mxu0 }
 0x5a3   :  { %v2357_v4 = vpop.f32.mrb[30].mxu0  ;;  %v4392_v3 = vld [vmem:[#allocation2 + $0x10] sm:$0xff] }
 0x5a4   :  { %v2626_v7 = vpack.c.bf16 %v2357_v4, %v2354_v17  ;;  %v4086_v12 = vpop.f32.mrb[31].mxu0 }
 0x5a6   :  { %4128 = vmatmul.mubr.msk.bf16.vlgmr.msra.gmra.mrb[32].mxu1 %vm1684_vm1, %v2626_v7  ;;  %v4393_v7 = vld [vmem:[#allocation2 + $0x18] sm:$0xff] }
 0x5a7   :  { %4132 = vmatpush3.bf16.msra.mxu1 %v4223_v45 }
 0x5a8   :  { %4133 = vmatprep.subr.bf16.mxu1 %v4224_v0 }
 0x5a9   :  { %v2442_v1 = vpop.f32.mrb[32].mxu0 }
 0x5aa   :  { %v4097_v43 = vpop.f32.mrb[33].mxu0 }
 0x5ab   :  { %v2445_v18 = vpop.f32.mrb[34].mxu0  ;;  %4134 = vmatpush3.bf16.msra.mxu1 %v4224_v0  ;;  %v4237_v43 = vld [vmem:[#allocation10 + $0x24] ss:$16 sps:$4 sm:$0xff]  }
 0x5ac   :  { %v2628_v8 = vpack.c.bf16 %v2445_v18, %v2442_v1  ;;  %v4098_v63 = vpop.f32.mrb[35].mxu0  ;;  %4139 = vmatprep.subr.bf16.mxu1 %v4225_v52  ;;  %v4235_v1 = vld [vmem:[#allocation10 + $0x20] ss:$16 sps:$4 sm:$0xff]   ;;  %v4238_v18 = vld [vmem:[#allocation10 + $0x28] ss:$16 sps:$4 sm:$0xff]   ;;  %3227 = vmatprep.subr.bf16.mxu0 %v4237_v43 }
 0x5ad   :  { %3228 = vmatpush1.bf16.msra.mxu0 %v4235_v1  ;;  %v4241_v63 = vld [vmem:[#allocation10 + $0x40] ss:$16 sps:$4 sm:$0xff]   ;;  %v2995_v1 = vsub.s32 2, %v4730_v54 }
 0x5c5   :  { %v2398_v26 = vpop.f32.mrb[20].mxu1 }
 0x5c6   :  { %v4091_v5 = vpop.f32.mrb[21].mxu1 }
 0x5c7   :  { %v2401_v28 = vpop.f32.mrb[22].mxu1  ;;  %v4244_v5 = vld [vmem:[#allocation10 + $0x48] ss:$16 sps:$4 sm:$0xff]  }
 0x5c8   :  { %v2627_v29 = vpack.c.bf16 %v2401_v28, %v2398_v26  ;;  %v4092_v31 = vpop.f32.mrb[23].mxu1  ;;  %v4243_v26 = vld [vmem:[#allocation10 + $0x44] ss:$16 sps:$4 sm:$0xff]   ;;  %v4246_v28 = vld [vmem:[#allocation10 + $0x4c] ss:$16 sps:$4 sm:$0xff]  }
 0x5c9   :  { %3229 = vmatprep.subr.bf16.mxu0 %v4243_v26  ;;  %v4252_v31 = vld [vmem:[#allocation10 + $0x6c] ss:$16 sps:$4 sm:$0xff]   ;;  %v2996_v26 = vrot.slane %v5273_v46, %v2995_v1 }
 0x5ca   :  { %4135 = vmatprep.mubr.msk.bf16.mxu1 %vm1684_vm1, %v2627_v29  ;;  %v4249_v29 = vld [vmem:[#allocation10 + $0x64] ss:$16 sps:$4 sm:$0xff]   ;;  %3230 = vmatpush1.bf16.msra.mxu0 %v4241_v63 }
 0x5cb   :  { %4136 = vmatmul.mubr.msk.bf16.vlgmr.msra.gmra.mrb[32].mxu1 %vm1684_vm1, %v2628_v8  ;;  %v4240_v8 = vld [vmem:[#allocation10 + $0x2c] ss:$16 sps:$4 sm:$0xff]   ;;  %3231 = vmatprep.subr.bf16.mxu0 %v4249_v29 }
 0x5cc   :  { %4140 = vmatpush3.bf16.msra.mxu1 %v4225_v52 }
 0x5cd   :  { %v2486_v10 = vpop.f32.mrb[24].mxu1  ;;  %4141 = vmatprep.subr.bf16.mxu1 %v4226_v62 }
 0x5ce   :  { %v4103_v33 = vpop.f32.mrb[25].mxu1 }
 0x5cf   :  { %v2489_v34 = vpop.f32.mrb[26].mxu1  ;;  %v4255_v33 = vld [vmem:[#allocation10 + $0x84] ss:$16 sps:$4 sm:$0xff]  }
 0x5d0   :  { %v2629_v47 = vpack.c.bf16 %v2489_v34, %v2486_v10  ;;  %v4104_v48 = vpop.f32.mrb[27].mxu1  ;;  %4142 = vmatpush3.bf16.msra.mxu1 %v4226_v62  ;;  %v4247_v62 = vld [vmem:[#allocation10 + $0x60] ss:$16 sps:$4 sm:$0xff]   ;;  %v4250_v10 = vld [vmem:[#allocation10 + $0x68] ss:$16 sps:$4 sm:$0xff]  }
 0x5d1   :  { %4147 = vmatprep.subr.bf16.mxu1 %v4227_v25  ;;  %3232 = vmatpush1.bf16.msra.mxu0 %v4247_v62  ;;  %v4256_v34 = vld [vmem:[#allocation10 + $0x88] ss:$16 sps:$4 sm:$0xff]   ;;  %v4261_v48 = vld [vmem:[#allocation10 + $0xa4] ss:$16 sps:$4 sm:$0xff]  }
 0x5d2   :  { %4143 = vmatprep.mubr.msk.bf16.mxu1 %vm1684_vm1, %v2629_v47  ;;  %v4258_v47 = vld [vmem:[#allocation10 + $0x8c] ss:$16 sps:$4 sm:$0xff]   ;;  %3233 = vmatprep.subr.bf16.mxu0 %v4255_v33 }
 0x5d3   :  { %v2530_v15 = vpop.f32.mrb[36].mxu0 }
 0x5d4   :  { %v4109_v40 = vpop.f32.mrb[37].mxu0 }
 0x5d5   :  { %v2533_v41 = vpop.f32.mrb[38].mxu0  ;;  %v4259_v40 = vld [vmem:[#allocation10 + $0xa0] ss:$16 sps:$4 sm:$0xff]  }
 0x5d6   :  { %v2630_v22 = vpack.c.bf16 %v2533_v41, %v2530_v15  ;;  %v4110_v49 = vpop.f32.mrb[39].mxu0  ;;  %v4264_v15 = vld [vmem:[#allocation10 + $0xac] ss:$16 sps:$4 sm:$0xff]   ;;  %v4262_v41 = vld [vmem:[#allocation10 + $0xa8] ss:$16 sps:$4 sm:$0xff]  }
 0x5d7   :  { %v2574_v51 = vpop.f32.mrb[28].mxu1  ;;  %v4270_v49 = vld [vmem:[#allocation10 + $0xcc] ss:$16 sps:$4 sm:$0xff]  }
 0x5d8   :  { %v4115_v44 = vpop.f32.mrb[29].mxu1  ;;  %4144 = vmatmul.mubr.msk.bf16.vlgmr.msra.gmra.mrb[32].mxu1 %vm1684_vm1, %v2630_v22  ;;  %v4267_v22 = vld [vmem:[#allocation10 + $0xc4] ss:$16 sps:$4 sm:$0xff]  }
 0x5d9   :  { %v2577_v27 = vpop.f32.mrb[30].mxu1  ;;  %4148 = vmatpush3.bf16.msra.mxu1 %v4227_v25  ;;  %v4253_v25 = vld [vmem:[#allocation10 + $0x80] ss:$16 sps:$4 sm:$0xff]   ;;  %v4273_v44 = vld [vmem:[#allocation10 + $0xe4] ss:$16 sps:$4 sm:$0xff]  }
 0x5da   :  { %v2631_v36 = vpack.c.bf16 %v2577_v27, %v2574_v51  ;;  %v4116_v20 = vpop.f32.mrb[31].mxu1  ;;  %4149 = vmatprep.subr.bf16.mxu1 %v4228_v42  ;;  %3234 = vmatpush1.bf16.msra.mxu0 %v4253_v25  ;;  %v4268_v51 = vld [vmem:[#allocation10 + $0xc8] ss:$16 sps:$4 sm:$0xff]   ;;  %v4276_v27 = vld [vmem:[#allocation10 + $0xec] ss:$16 sps:$4 sm:$0xff]  }
 0x5db   :  { %v2618_v55 = vpop.f32.mrb[40].mxu0  ;;  %3235 = vmatprep.subr.bf16.mxu0 %v4261_v48  ;;  %v4274_v20 = vld [vmem:[#allocation10 + $0xe8] ss:$16 sps:$4 sm:$0xff]  }
 0x5dc   :  { %v4121_v19 = vpop.f32.mrb[41].mxu0  ;;  %4151 = vmatprep.mubr.msk.bf16.mxu1 %vm1684_vm1, %v2631_v36  ;;  %v4271_v36 = vld [vmem:[#allocation10 + $0xe0] ss:$16 sps:$4 sm:$0xff]  }
 0x5dd   :  { %v2621_v13 = vpop.f32.mrb[42].mxu0  ;;  %4150 = vmatpush3.bf16.msra.mxu1 %v4228_v42  ;;  %v4265_v42 = vld [vmem:[#allocation10 + $0xc0] ss:$16 sps:$4 sm:$0xff]  }
 0x5de   :  { %v2632_v37 = vpack.c.bf16 %v2621_v13, %v2618_v55  ;;  %v4122_v14 = vpop.f32.mrb[43].mxu0  ;;  %3278 = vmatprep.subr.bf16.mxu1 %v4234_v11  ;;  %3236 = vmatpush1.bf16.msra.mxu0 %v4259_v40  ;;  %v4277_v55 = vld [vmem:[#allocation11 + $0x40] sm:$0xff]  }
 0x5df   :  { %3237 = vmatprep.subr.bf16.mxu0 %v4267_v22  ;;  %v4278_v19 = vld [vmem:[#allocation11 + $0xc0] sm:$0xff]  }
 0x5e2   :  { %3238 = vmatpush1.bf16.msra.mxu0 %v4265_v42  ;;  %v4279_v42 = vld [vmem:[#allocation11] sm:$0xff]  }
 0x5e3   :  { %3239 = vmatprep.subr.bf16.mxu0 %v4273_v44 }
 0x5e4   :  { %4152 = vmatmul.mubr.msk.bf16.vlgmr.msra.gmra.mrb[32].mxu1 %vm1684_vm1, %v2632_v37 }
 0x5e5   :  { %3310 = vmatprep.mubr.bf16.mxu1 %v4572_v30  ;;  %3279 = vmatpush1.bf16.msra.mxu1 %v4232_v59 }
 0x5e6   :  { %3280 = vmatprep.subr.bf16.mxu1 %v4240_v8  ;;  %3240 = vmatpush1.bf16.msra.mxu0 %v4271_v36  ;;  %v4282_v36 = vld [vmem:[#allocation11 + $0xc8] sm:$0xff]  }
 0x5e7   :  { %3951 = vmatprep.subr.bf16.mxu0 %v4277_v55 }
 0x5e9   :  { %3281 = vmatpush1.bf16.msra.mxu1 %v4238_v18 }
 0x5ea   :  { %3282 = vmatprep.subr.bf16.mxu1 %v4246_v28 }
 0x5ed   :  { %3283 = vmatpush1.bf16.msra.mxu1 %v4244_v5  ;;  %v3003_v5 = vsub.s32 3, %v4730_v54 }
 0x5ee   :  { %3284 = vmatprep.subr.bf16.mxu1 %v4252_v31 }
 0x5ef   :  { %v3004_v33 = vrot.slane %v5273_v46, %v3003_v5 }
 0x5f1   :  { %3285 = vmatpush1.bf16.msra.mxu1 %v4250_v10 }
 0x5f2   :  { %3286 = vmatprep.subr.bf16.mxu1 %v4258_v47 }
 0x5f5   :  { %3287 = vmatpush1.bf16.msra.mxu1 %v4256_v34 }
 0x5f6   :  { %3288 = vmatprep.subr.bf16.mxu1 %v4264_v15 }
 0x5f9   :  { %3289 = vmatpush1.bf16.msra.mxu1 %v4262_v41 }
 0x5fa   :  { %3290 = vmatprep.subr.bf16.mxu1 %v4270_v49 }
 0x5fd   :  { %3291 = vmatpush1.bf16.msra.mxu1 %v4268_v51  ;;  %v4280_v51 = vld [vmem:[#allocation11 + $0x80] sm:$0xff]  }
 0x5fe   :  { %3292 = vmatprep.subr.bf16.mxu1 %v4276_v27  ;;  %v4281_v27 = vld [vmem:[#allocation11 + $0x48] sm:$0xff]  }
 0x601   :  { %3293 = vmatpush1.bf16.msra.mxu1 %v4274_v20 }
 0x602   :  { %3979 = vmatprep.subr.bf16.mxu1 %v4278_v19 }
 0x6b7   :  { %v4153_v23 = vpop.f32.mrb[32].mxu1 }
 0x6b8   :  { %v2902_v6 = vpop.f32.mrb[33].mxu1  ;;  %v2935_v32 = vadd.f32 %v4153_v23, %v2932_v16 }
 0x6b9   :  { %v2933_v38 = vadd.f32 %v2932_v16, %v2902_v6  ;;  %v4154_v39 = vpop.f32.mrb[34].mxu1 }
 0x6ba   :  { %v2905_v56 = vpop.f32.mrb[35].mxu1  ;;  %v2936_v53 = vadd.f32 %v4154_v39, %v2932_v16  ;;  %v5286_v4 = vadd.f32 %v4392_v3, %v2935_v32 }
 0x6bb   :  { %v5276_v50 = vadd.f32 %v4390_v35, %v2933_v38  ;;  %v2934_v45 = vadd.f32 %v2932_v16, %v2905_v56 }
 0x6bc   :  { %v5288_v12 = vadd.f32 %v4393_v7, %v2936_v53  ;;  %v2955_v0 = vmul.f32 %v5286_v4, %v5286_v4 }
 0x6bd   :  { %v5278_v58 = vadd.f32 %v4391_v57, %v2934_v45  ;;  %2941 = vadd.xlane.f32.xlu0 %v5276_v50  ;;  %v2953_v2 = vmul.f32 %v5276_v50, %v5276_v50 }
 0x6be   :  { %v2956_v52 = vmul.f32 %v5288_v12, %v5288_v12 }
 0x6bf   :  { %2943 = vadd.xlane.f32.xlu1 %v5278_v58  ;;  %v2954_v17 = vmul.f32 %v5278_v58, %v5278_v58 }
 0x6c1   :  { %2957 = vadd.xlane.f32.xlu0 %v2953_v2 }
 0x6c3   :  { %2959 = vadd.xlane.f32.xlu1 %v2954_v17 }
 0x6c5   :  { %2945 = vadd.xlane.f32.xlu0 %v5286_v4 }
 0x6c7   :  { %2947 = vadd.xlane.f32.xlu1 %v5288_v12 }
 0x6c9   :  { %2961 = vadd.xlane.f32.xlu0 %v2955_v0 }
 0x6cb   :  { %2963 = vadd.xlane.f32.xlu1 %v2956_v52 }
 0x74a   :  { %v2942_v13 = vpop.xlane.xlu0 %2941 }
 0x74b   :  { %v2949_v37 = vmul.f32 0.0078125, %v2942_v13  ;;  %v4283_v13 = vld [vmem:[#allocation11 + $0x8] sm:$0xff]  }
 0x74c   :  { %v2944_v14 = vpop.xlane.xlu1 %2943 }
 0x74d   :  { %v2950_v24 = vmul.f32 0.0078125, %v2944_v14  ;;  %v2969_v59 = vmul.f32 %v2949_v37, %v2949_v37  ;;  %v2977_v63 = vsub.f32 %v5276_v50, %v2949_v37  ;;  %v4284_v37 = vld [vmem:[#allocation11 + $0x88] sm:$0xff]   ;;  %v4285_v14 = vld [vmem:[#allocation11 + $0x50] sm:$0xff]  }
 0x74e   :  { %v2958_v21 = vpop.xlane.xlu0 %2957 }
 0x74f   :  { %v2965_v11 = vmul.f32 0.0078125, %v2958_v21  ;;  %v2970_v16 = vmul.f32 %v2950_v24, %v2950_v24  ;;  %v2978_v29 = vsub.f32 %v5278_v58, %v2950_v24  ;;  %v4286_v24 = vld [vmem:[#allocation11 + $0xd0] sm:$0xff]  }
 0x750   :  { %v2960_v61 = vpop.xlane.xlu1 %2959 }
 0x751   :  { %v2973_v23 = vsub.f32 %v2965_v11, %v2969_v59  ;;  %v2966_v6 = vmul.f32 0.0078125, %v2960_v61  ;;  %v4287_v61 = vld [vmem:[#allocation11 + $0x10] sm:$0xff]  }
 0x752   :  { %v2946_v38 = vpop.xlane.xlu0 %2945 }
 0x753   :  { %v2981_v39 = vadd.f32 1e-05, %v2973_v23  ;;  %v2974_v56 = vsub.f32 %v2966_v6, %v2970_v16  ;;  %v2951_v35 = vmul.f32 0.0078125, %v2946_v38  ;;  %v4288_v16 = vld [vmem:[#allocation11 + $0x90] sm:$0xff]   ;;  %v4289_v23 = vld [vmem:[#allocation11 + $0x58] sm:$0xff]  }
 0x754   :  { %v2948_v45 = vpop.xlane.xlu1 %2947  ;;  %v4291_v6 = vld [vmem:[#allocation11 + $0x18] sm:$0xff]  }
 0x755   :  { %4381 = vrsqrt.f32 %v2981_v39  ;;  %v2982_v57 = vadd.f32 1e-05, %v2974_v56  ;;  %v2952_v32 = vmul.f32 0.0078125, %v2948_v45  ;;  %v2971_v53 = vmul.f32 %v2951_v35, %v2951_v35  ;;  %v4292_v38 = vld [vmem:[#allocation11 + $0x98] sm:$0xff]   ;;  %v4293_v39 = vld [vmem:[#allocation11 + $0x60] sm:$0xff]  }
 0x756   :  { %v2962_v2 = vpop.xlane.xlu0 %2961  ;;  %v2979_v47 = vsub.f32 %v5286_v4, %v2951_v35  ;;  %v4294_v56 = vld [vmem:[#allocation11 + $0xe0] sm:$0xff]  }
 0x757   :  { %4383 = vrsqrt.f32 %v2982_v57  ;;  %v2967_v17 = vmul.f32 0.0078125, %v2962_v2  ;;  %v2972_v7 = vmul.f32 %v2952_v32, %v2952_v32  ;;  %v2980_v41 = vsub.f32 %v5288_v12, %v2952_v32  ;;  %v4295_v35 = vld [vmem:[#allocation11 + $0x20] sm:$0xff]   ;;  %v4297_v57 = vld [vmem:[#allocation11 + $0x68] sm:$0xff]  }
 0x758   :  { %v2964_v3 = vpop.xlane.xlu1 %2963  ;;  %v4296_v45 = vld [vmem:[#allocation11 + $0xa0] sm:$0xff]   ;;  %v4298_v32 = vld [vmem:[#allocation11 + $0xe8] sm:$0xff]  }
 0x759   :  { %v2975_v0 = vsub.f32 %v2967_v17, %v2971_v53  ;;  %v2968_v52 = vmul.f32 0.0078125, %v2964_v3  ;;  %v4299_v2 = vld [vmem:[#allocation11 + $0x28] sm:$0xff]   ;;  %v4301_v17 = vld [vmem:[#allocation11 + $0x70] sm:$0xff]  }
 0x75a   :  { %v4300_v53 = vld [vmem:[#allocation11 + $0xa8] sm:$0xff]   ;;  %v4302_v3 = vld [vmem:[#allocation11 + $0xf0] sm:$0xff]  }
 0x75b   :  { %v2983_v43 = vadd.f32 1e-05, %v2975_v0  ;;  %v2976_v18 = vsub.f32 %v2968_v52, %v2972_v7  ;;  %v4303_v7 = vld [vmem:[#allocation11 + $0x30] sm:$0xff]   ;;  %v4305_v52 = vld [vmem:[#allocation11 + $0x78] sm:$0xff]  }
 0x75c   :  { %v4304_v0 = vld [vmem:[#allocation11 + $0xb0] sm:$0xff]  }
 0x75d   :  { %4385 = vrsqrt.f32 %v2983_v43  ;;  %v2984_v8 = vadd.f32 1e-05, %v2976_v18  ;;  %v4306_v43 = vld [vmem:[#allocation11 + $0xf8] sm:$0xff]  }
 0x75e   :  { %v4307_v18 = vld [vmem:[#allocation11 + $0x38] sm:$0xff]  }
 0x75f   :  { %v4382_v28 = vpop.eup %4381  ;;  %4387 = vrsqrt.f32 %v2984_v8  ;;  %v4308_v8 = vld [vmem:[#allocation11 + $0xb8] sm:$0xff]  }
 0x760   :  { %v2989_v31 = vmul.f32 %v4382_v28, %v2977_v63  ;;  %v3043_v63 = vld [vmem:[%s5344_s2] sm:$0xf]  ;;  %s4579_s2 = smov [#allocation13]  }
 0x761   :  { %v4384_v62 = vpop.eup %4383  ;;  %v3056_v28 = vrot.slane %v3043_v63, %v2995_v1  ;;  %s3726_s11 = sshll.u32 %s4579_s2, 4  ;;  %s3727_s11 = int_to_ptr.vmem [resolvable:$true] %s3726_s11 }
 0x762   :  { %v2990_v10 = vmul.f32 %v4384_v62, %v2978_v29  ;;  %v2997_v25 = vmul.f32 %v2996_v26, %v2989_v31  ;;  %v3052_v29 = vrot.slane %v3043_v63, %v176_v9  ;;  %v3060_v31 = vrot.slane %v3043_v63, %v3003_v5  ;;  %s4526_s12 = scalar_lea.vmem %s3727_s11, 512  ;;  %p4531_p7 = scmp.lt.s32.totalorder %s3727_s11, %s3727_s11 }
 0x763   :  { %p4527_p6 = scmp.ne.s32.totalorder %s3727_s11, %s4526_s12  ;;  %p4532_p8 = scmp.lt.s32.totalorder %s4526_s12, %s4526_s12 }
 0x764   :  { %v2998_v34 = vmul.f32 %v2996_v26, %v2990_v10  ;;  %v3005_v48 = vadd.f32 %v3004_v33, %v2997_v25 }
 0x765   :  { %p4533_p9 = por %p4532_p8, %p4531_p7 }
 0x766   :  { %v3006_v15 = vadd.f32 %v3004_v33, %v2998_v34 }
 0x767   :  { %v4386_v40 = vpop.eup %4385  ;;  %p4534_p10 = pnand %p4533_p9, %p4527_p6 }
 0x768   :  { %v3009_v22 = vpack.c.bf16 %v3006_v15, %v3005_v48  ;;  %v2991_v49 = vmul.f32 %v4386_v40, %v2979_v47 }
 0x769   :  { %v4388_v44 = vpop.eup %4387 }
 0x76a   :  { %3258 = vmatmul.mubr.bf16.vlgmr.msra.gmra.mrb[44].mxu0 %v3009_v22  ;;  %3311 = vmatmul.mubr.bf16.vlgmr.msra.gmra.mrb[36].mxu1 %v3009_v22  ;;  %v2992_v20 = vmul.f32 %v4388_v44, %v2980_v41  ;;  %v2999_v55 = vmul.f32 %v2996_v26, %v2991_v49 }
 0x76b   :  { %3267 = vmatprep.mubr.bf16.mxu0 %v4572_v30  ;;  %3320 = vmatprep.mubr.bf16.mxu1 %v4572_v30  ;;  %v4290_v30 = vld [vmem:[#allocation11 + $0xd8] sm:$0xff]  }
 0x76c   :  { %v3000_v19 = vmul.f32 %v2996_v26, %v2992_v20  ;;  %3952 = vmatpush3.bf16.msra.mxu0 %v4279_v42  ;;  %3980 = vmatpush3.bf16.msra.mxu1 %v4280_v51  ;;  %v3007_v21 = vadd.f32 %v3004_v33, %v2999_v55  ;;  %v3048_v26 = vrot.slane %v3043_v63, %v168_v60 }
 0x76d   :  { %3953 = vmatprep.subr.bf16.mxu0 %v4281_v27  ;;  %3981 = vmatprep.subr.bf16.mxu1 %v4282_v36 }
 0x76e   :  { %v3008_v59 = vadd.f32 %v3004_v33, %v3000_v19 }
 0x770   :  { %v3010_v11 = vpack.c.bf16 %v3008_v59, %v3007_v21  ;;  %3954 = vmatpush3.bf16.msra.mxu0 %v4283_v13  ;;  %3982 = vmatpush3.bf16.msra.mxu1 %v4284_v37 }
 0x771   :  { %3955 = vmatprep.subr.bf16.mxu0 %v4285_v14  ;;  %3983 = vmatprep.subr.bf16.mxu1 %v4286_v24 }
 0x772   :  { %3268 = vmatmul.mubr.bf16.gmra.mrb[48].mxu0 %v3010_v11  ;;  %3321 = vmatmul.mubr.bf16.gmra.mrb[40].mxu1 %v3010_v11 }
 0x774   :  { %3956 = vmatpush3.bf16.msra.mxu0 %v4287_v61  ;;  %3984 = vmatpush3.bf16.msra.mxu1 %v4288_v16 }
 0x775   :  { %3957 = vmatprep.subr.bf16.mxu0 %v4289_v23  ;;  %3985 = vmatprep.subr.bf16.mxu1 %v4290_v30 }
 0x778   :  { %3958 = vmatpush3.bf16.msra.mxu0 %v4291_v6  ;;  %3986 = vmatpush3.bf16.msra.mxu1 %v4292_v38 }
 0x779   :  { %3959 = vmatprep.subr.bf16.mxu0 %v4293_v39  ;;  %3987 = vmatprep.subr.bf16.mxu1 %v4294_v56 }
 0x77c   :  { %3960 = vmatpush3.bf16.msra.mxu0 %v4295_v35  ;;  %3988 = vmatpush3.bf16.msra.mxu1 %v4296_v45 }
 0x77d   :  { %3961 = vmatprep.subr.bf16.mxu0 %v4297_v57  ;;  %3989 = vmatprep.subr.bf16.mxu1 %v4298_v32 }
 0x780   :  { %3962 = vmatpush3.bf16.msra.mxu0 %v4299_v2  ;;  %3990 = vmatpush3.bf16.msra.mxu1 %v4300_v53 }
 0x781   :  { %3963 = vmatprep.subr.bf16.mxu0 %v4301_v17  ;;  %3991 = vmatprep.subr.bf16.mxu1 %v4302_v3 }
 0x784   :  { %3964 = vmatpush3.bf16.msra.mxu0 %v4303_v7  ;;  %3992 = vmatpush3.bf16.msra.mxu1 %v4304_v0 }
 0x785   :  { %3965 = vmatprep.subr.bf16.mxu0 %v4305_v52  ;;  %3993 = vmatprep.subr.bf16.mxu1 %v4306_v43 }
 0x788   :  { %3966 = vmatpush3.bf16.msra.mxu0 %v4307_v18  ;;  %3994 = vmatpush3.bf16.msra.mxu1 %v4308_v8 }
 0x83d   :  { %v3259_v62 = vpop.f32.mrb[44].mxu0  ;;  %v3312_v10 = vpop.f32.mrb[36].mxu1 }
 0x83e   :  { %v3260_v25 = vadd.f32 %v3259_v62, %v3048_v26  ;;  %v3313_v33 = vadd.f32 %v3312_v10, %v3056_v28  ;;  %v3261_v34 = vpop.f32.mrb[45].mxu0  ;;  %v3314_v47 = vpop.f32.mrb[37].mxu1 }
 0x83f   :  { %v3262_v48 = vadd.f32 %v3261_v34, %v3052_v29  ;;  %v3315_v15 = vadd.f32 %v3314_v47, %v3060_v31  ;;  %v3263_v40 = vpop.f32.mrb[46].mxu0  ;;  %v3316_v41 = vpop.f32.mrb[38].mxu1 }
 0x840   :  { %v3264_v60 = vadd.f32 %v3263_v40, %v3048_v26  ;;  %v3317_v22 = vadd.f32 %v3316_v41, %v3056_v28  ;;  %v3265_v49 = vpop.f32.mrb[47].mxu0  ;;  %v3318_v1 = vpop.f32.mrb[39].mxu1  ;;  %v3331_v9 = vmax.f32 %v3260_v25, 0.0  ;;  %v3333_v44 = vmax.f32 %v3313_v33, 0.0 }
 0x841   :  { %v3266_v42 = vadd.f32 %v3265_v49, %v3052_v29  ;;  %v3319_v51 = vadd.f32 %v3318_v1, %v3060_v31  ;;  %v3332_v36 = vmax.f32 %v3262_v48, 0.0  ;;  %v3334_v20 = vmax.f32 %v3315_v15, 0.0 }
 0x842   :  { %v3335_v27 = vmax.f32 %v3264_v60, 0.0  ;;  %v3337_v5 = vmax.f32 %v3317_v22, 0.0 }
 0x843   :  { %v3336_v55 = vmax.f32 %v3266_v42, 0.0  ;;  %v3338_v19 = vmax.f32 %v3319_v51, 0.0 }
 0x844   :  { %v3347_v13 = vpack.c.bf16 %v3335_v27, %v3331_v9  ;;  %v3349_v37 = vpack.c.bf16 %v3337_v5, %v3333_v44 }
 0x845   :  { %v3348_v14 = vpack.c.bf16 %v3336_v55, %v3332_v36  ;;  %v3350_v24 = vpack.c.bf16 %v3338_v19, %v3334_v20  ;;  %v3269_v21 = vpop.f32.mrb[48].mxu0  ;;  %v3322_v59 = vpop.f32.mrb[40].mxu1 }
 0x846   :  { %v3270_v11 = vadd.f32 %v3269_v21, %v3048_v26  ;;  %v3323_v61 = vadd.f32 %v3322_v59, %v3056_v28  ;;  %v3271_v16 = vpop.f32.mrb[49].mxu0  ;;  %v3324_v23 = vpop.f32.mrb[41].mxu1 }
 0x847   :  { %v3272_v30 = vadd.f32 %v3271_v16, %v3052_v29  ;;  %v3325_v6 = vadd.f32 %v3324_v23, %v3060_v31  ;;  %v3273_v38 = vpop.f32.mrb[50].mxu0  ;;  %v3326_v39 = vpop.f32.mrb[42].mxu1  ;;  %3647 = vmatprep.mubr.bf16.mxu0 %v3348_v14  ;;  %3696 = vmatprep.mubr.bf16.mxu1 %v3350_v24 }
 0x848   :  { %v3274_v56 = vadd.f32 %v3273_v38, %v3048_v26  ;;  %v3327_v35 = vadd.f32 %v3326_v39, %v3056_v28  ;;  %v3275_v45 = vpop.f32.mrb[51].mxu0  ;;  %v3328_v57 = vpop.f32.mrb[43].mxu1  ;;  %3648 = vmatmul.mubr.bf16.vlgmr.msra.gmra.mrb[52].mxu0 %v3347_v13  ;;  %3697 = vmatmul.mubr.bf16.vlgmr.msra.gmra.mrb[44].mxu1 %v3349_v37  ;;  %v3339_v53 = vmax.f32 %v3270_v11, 0.0  ;;  %v3341_v17 = vmax.f32 %v3323_v61, 0.0 }
 0x849   :  { %v3276_v32 = vadd.f32 %v3275_v45, %v3052_v29  ;;  %v3329_v2 = vadd.f32 %v3328_v57, %v3060_v31  ;;  %v3340_v0 = vmax.f32 %v3272_v30, 0.0  ;;  %v3342_v52 = vmax.f32 %v3325_v6, 0.0 }
 0x84a   :  { %v3343_v3 = vmax.f32 %v3274_v56, 0.0  ;;  %v3345_v7 = vmax.f32 %v3327_v35, 0.0  ;;  %v3421_v26 = vsub.s32 5, %v4730_v54 }
 0x84b   :  { %v3344_v43 = vmax.f32 %v3276_v32, 0.0  ;;  %v3346_v18 = vmax.f32 %v3329_v2, 0.0 }
 0x84c   :  { %v3351_v8 = vpack.c.bf16 %v3343_v3, %v3339_v53  ;;  %v3353_v63 = vpack.c.bf16 %v3345_v7, %v3341_v17  ;;  %v3422_v31 = vrot.slane %v5273_v46, %v3421_v26 }
 0x84d   :  { %v3352_v62 = vpack.c.bf16 %v3344_v43, %v3340_v0  ;;  %v3354_v10 = vpack.c.bf16 %v3346_v18, %v3342_v52 }
 0x84f   :  { %3655 = vmatprep.mubr.bf16.mxu0 %v3352_v62  ;;  %3704 = vmatprep.mubr.bf16.mxu1 %v3354_v10 }
 0x850   :  { %3656 = vmatmul.mubr.bf16.gmra.mrb[56].mxu0 %v3351_v8  ;;  %3705 = vmatmul.mubr.bf16.gmra.mrb[48].mxu1 %v3353_v63 }
 0x91b   :  { %v3967_v28 = vpop.f32.mrb[52].mxu0  ;;  %v3995_v29 = vpop.f32.mrb[44].mxu1 }
 0x91c   :  { %v3968_v25 = vpop.f32.mrb[53].mxu0  ;;  %v3996_v33 = vpop.f32.mrb[45].mxu1 }
 0x91d   :  { %v3969_v34 = vadd.f32 %v3968_v25, %v3967_v28  ;;  %v3997_v47 = vadd.f32 %v3996_v33, %v3995_v29  ;;  %v3970_v48 = vpop.f32.mrb[54].mxu0  ;;  %v3998_v15 = vpop.f32.mrb[46].mxu1 }
 0x91e   :  { %v3971_v40 = vpop.f32.mrb[55].mxu0  ;;  %v3999_v41 = vpop.f32.mrb[47].mxu1 }
 0x91f   :  { %v3650_v60 = vadd.f32 %v3969_v34, %v3422_v31  ;;  %v3972_v22 = vadd.f32 %v3971_v40, %v3970_v48  ;;  %v4000_v49 = vadd.f32 %v3999_v41, %v3998_v15 }
 0x921   :  { %v3699_v1 = vadd.f32 %v3997_v47, %v3650_v60  ;;  %v3653_v42 = vadd.f32 %v3972_v22, %v3422_v31 }
 0x923   :  { %v3713_v51 = vadd.f32 %v3699_v1, %v5276_v50  ;;  %v3702_v54 = vadd.f32 %v4000_v49, %v3653_v42  ;;  %v3973_v9 = vpop.f32.mrb[56].mxu0  ;;  %v4001_v44 = vpop.f32.mrb[48].mxu1 }
 0x924   :  { %v3974_v27 = vpop.f32.mrb[57].mxu0  ;;  %v4002_v46 = vpop.f32.mrb[49].mxu1 }
 0x925   :  { %3717 = vst [vmem:[#allocation13] sm:$0xff] %v3713_v51  ;;  %v3714_v5 = vadd.f32 %v3702_v54, %v5278_v58  ;;  %v3975_v36 = vadd.f32 %v3974_v27, %v3973_v9  ;;  %v4003_v20 = vadd.f32 %v4002_v46, %v4001_v44  ;;  %v3976_v55 = vpop.f32.mrb[58].mxu0  ;;  %v4004_v19 = vpop.f32.mrb[50].mxu1 }
 0x926   :  { %v3977_v13 = vpop.f32.mrb[59].mxu0  ;;  %v4005_v37 = vpop.f32.mrb[51].mxu1 }
 0x927   :  { %3718 = vst [vmem:[#allocation13 + $0x8] sm:$0xff] %v3714_v5  ;;  %v3658_v14 = vadd.f32 %v3975_v36, %v3422_v31  ;;  %v3978_v24 = vadd.f32 %v3977_v13, %v3976_v55  ;;  %v4006_v21 = vadd.f32 %v4005_v37, %v4004_v19 }
 0x929   :  { %v3707_v59 = vadd.f32 %v4003_v20, %v3658_v14  ;;  %v3661_v50 = vadd.f32 %v3978_v24, %v3422_v31 }
 0x92b   :  { %v3715_v11 = vadd.f32 %v3707_v59, %v5286_v4  ;;  %v3710_v61 = vadd.f32 %v4006_v21, %v3661_v50 }
 0x92d   :  { %3719 = vst [vmem:[#allocation13 + $0x10] sm:$0xff] %v3715_v11  ;;  %v3716_v58 = vadd.f32 %v3710_v61, %v5288_v12 }
 0x92f   :  { %3720 = vst [vmem:[#allocation13 + $0x18] sm:$0xff] %v3716_v58 }
 0x930   :  { %4537 = shalt.err (!%p4534_p10)
}
 0x931   :  { %s4538_s15 = scalar_lea.hbm %s5349_s7, 512 }
 0x932   :  { %p4539_p11 = scmp.ne.s32.totalorder %s5349_s7, %s4538_s15  ;;  %p4542_p12 = scmp.lt.u32.totalorder %s4538_s15, %s5349_s7 }
 0x934   :  { %p4544_p13 = pnand %p4542_p12, %p4539_p11 }
 0x936   :  { %4547 = shalt.err (!%p4544_p13)
}
 0x937   :  { %3732 = dma.vmem_to_hbm [thread:$0]  %s3727_s11, 512, %s5349_s7, [#allocation4], %s4563_s4, %s4563_s4, %s4564_s27  }
 0x938   :  { %4556 = dma.done.wait [#allocation4], 512  }
 0x939   :  { %4557 = vsyncadd [#allocation4], 4294966784 }
 0x93a   :  { %3736 = vsyncpa [#allocation3], 1 }
 0x93b   :  { %3737 = vsyncpa [#allocation6], 1 }
 0x93c   :  { %3738 = vsyncpa [#allocation9], 1 }
 0x93d   :  { %3739 = vsyncpa [#allocation12], 1 }
 0x93e   :  { %3740 = vsyncpa [#allocation4], 1 }

</bundles_post_ra>
